<compile_context>
chip_gen: v6e
topology: v6e:2x2x1
jax: 0.10.0
libtpu: 0.0.40
codegen_flags: <defaults>
</compile_context>

<pallas_src>
import math

import jax
import jax.numpy as jnp
from jax.experimental import pallas as pl
from jax.experimental.pallas import tpu as pltpu


def _round_up(x, m):
    return ((x + m - 1) // m) * m


def _make_kernel(b_tile, n_h, n_p, embed_dim):
    """Kernel factory: b_tile batches folded into the token dimension."""
    scale = 1.0 / math.sqrt(float(embed_dim))  # logical embed dim, not padded
    bf16 = jnp.bfloat16

    def kernel(tok_ref, noise_ref, ptok_ref,
               wq_ref, wk_ref, wv_ref, wo_ref,
               w1_ref, w2_ref,
               wq2_ref, wk2_ref, wv2_ref,
               wmean_ref, wlogstd_ref,
               out_ref):
        E = embed_dim
        m_h = b_tile * n_h
        m_p = b_tile * n_p

        tok_bf = tok_ref[...]                       # (m_h, E) bf16, pre-embedded
        tok = tok_bf.astype(jnp.float32)

        # ---- encoder: self-attention (block-diagonal over the folded batch) ----
        q = jnp.dot(tok_bf, wq_ref[...], preferred_element_type=jnp.float32)
        k = jnp.dot(tok_bf, wk_ref[...], preferred_element_type=jnp.float32)
        v = jnp.dot(tok_bf, wv_ref[...], preferred_element_type=jnp.float32)

        qb = q.reshape(b_tile, n_h, E).astype(bf16)
        kb = k.reshape(b_tile, n_h, E).astype(bf16)
        vb = v.reshape(b_tile, n_h, E).astype(bf16)

        # contract on the last axis of both operands: no materialized k.T
        s = jnp.einsum("bqd,bkd->bqk", qb, kb,
                       preferred_element_type=jnp.float32) * scale
        s = s - jnp.max(s, axis=-1, keepdims=True)
        p = jnp.exp(s)
        p = p * pl.reciprocal(jnp.sum(p, axis=-1, keepdims=True), approx=True)
        attn = jnp.einsum("bqk,bkd->bqd", p.astype(bf16), vb,
                          preferred_element_type=jnp.float32)
        attn = attn.reshape(m_h, E)

        h = tok + jnp.dot(attn.astype(bf16), wo_ref[...],
                          preferred_element_type=jnp.float32)
        ffn_h = jnp.maximum(
            jnp.dot(h.astype(bf16), w1_ref[...],
                    preferred_element_type=jnp.float32), 0.0)
        ffn = jnp.dot(ffn_h.astype(bf16), w2_ref[...],
                      preferred_element_type=jnp.float32)
        enc = h + ffn                               # (m_h, E) f32
        enc_bf = enc.astype(bf16)

        # ---- decoder: prediction tokens cross-attend to encoded history ----
        ptok = ptok_ref[...]                        # (n_p, E) bf16 (batch-shared)
        qp = jnp.dot(ptok, wq2_ref[...], preferred_element_type=jnp.float32)
        qp_b = jnp.broadcast_to(qp.astype(bf16)[None], (b_tile, n_p, E))
        kp = jnp.dot(enc_bf, wk2_ref[...],
                     preferred_element_type=jnp.float32).reshape(b_tile, n_h, E)
        vp = jnp.dot(enc_bf, wv2_ref[...],
                     preferred_element_type=jnp.float32).reshape(b_tile, n_h, E)

        s2 = jnp.einsum("bqd,bkd->bqk", qp_b, kp.astype(bf16),
                        preferred_element_type=jnp.float32) * scale
        s2 = s2 - jnp.max(s2, axis=-1, keepdims=True)
        p2 = jnp.exp(s2)
        p2 = p2 * pl.reciprocal(jnp.sum(p2, axis=-1, keepdims=True), approx=True)
        ctx = jnp.einsum("bqk,bkd->bqd", p2.astype(bf16), vp.astype(bf16),
                         preferred_element_type=jnp.float32)
        ctx = ctx.reshape(m_p, E)                   # (m_p, E) f32

        # ---- Gaussian head: lane reductions instead of a (E, 2) MXU matmul ----
        mean = jnp.sum(ctx * wmean_ref[...], axis=-1, keepdims=True)     # (m_p, 1)
        log_std = jnp.sum(ctx * wlogstd_ref[...], axis=-1, keepdims=True)
        log_std = jnp.clip(log_std, -15.0, 15.0)
        std = jnp.exp(log_std)

        # lane-dense full-width store (num_samples padded to 128 in the wrapper)
        out_ref[...] = mean + std * noise_ref[...]                       # (m_p, NS_PAD)

    return kernel


def make_params(key, num_series, context_length, prediction_length,
                embed_dim=128, ffn_dim=256):
    # embed_dim=128 fills the MXU contraction width (use 256 on v6e/v7x for
    # full 2x256x256 utilization if the model is scaled up).
    S, Th, Tp, E, F = num_series, context_length, prediction_length, embed_dim, ffn_dim
    keys = jax.random.split(key, 16)
    init = lambda k, shape, s=0.1: (s * jax.random.normal(k, shape)).astype(jnp.float32)
    bf16 = jnp.bfloat16

    pos_emb = init(keys[0], (Th + Tp, E))
    ser_emb = init(keys[1], (S, E))
    b_val = init(keys[2], (E,))
    # bias_h[s*Th + t] = ser_emb[s] + pos_emb[t] + b_val        (history tokens)
    bias_h = (ser_emb[:, None, :] + pos_emb[None, :Th, :] + b_val).reshape(S * Th, E)
    # bias_p[s*Tp + t] = ser_emb[s] + pos_emb[Th + t] + b_val   (prediction tokens)
    bias_p = (ser_emb[:, None, :] + pos_emb[None, Th:Th + Tp, :] + b_val).reshape(S * Tp, E)

    return dict(
        bias_h=bias_h.astype(jnp.float32),        # used in wrapper-side embedding
        ptok=bias_p.astype(bf16),                 # prediction-token embeddings (kernel)
        wval=init(keys[3], (E,)),                 # value -> embed scaling (wrapper)
        wq=init(keys[4], (E, E)).astype(bf16),
        wk=init(keys[5], (E, E)).astype(bf16),
        wv=init(keys[6], (E, E)).astype(bf16),
        wo=init(keys[7], (E, E)).astype(bf16),
        w1=init(keys[8], (E, F)).astype(bf16),
        w2=init(keys[9], (F, E)).astype(bf16),
        wq2=init(keys[10], (E, E)).astype(bf16),
        wk2=init(keys[11], (E, E)).astype(bf16),
        wv2=init(keys[12], (E, E)).astype(bf16),
        wmean=init(keys[13], (1, E)),
        wlogstd=init(keys[14], (1, E)),
    )


def tactis_forward(past_target_norm, params, *, num_series, context_length,
                   prediction_length, num_parallel_samples, noise_key):
    """Mirrors TactisNetwork.forward: returns [batch, num_samples, pred_len, series]."""
    B, Th, S = past_target_norm.shape
    assert Th == context_length and S == num_series
    Tp, NS = prediction_length, num_parallel_samples
    N_h, N_p = S * Th, S * Tp
    E = params["wq"].shape[0]
    F = params["w1"].shape[1]
    NS_PAD = _round_up(NS, 128)   # lane-dense output / noise

    # At most 2 "parallel" grid steps (one per v7x TensorCore); remaining
    # batches are folded into the token (M) dimension of each step.
    num_tiles = 2 if (B % 2 == 0 and B >= 2) else 1
    b_tile = B // num_tiles
    m_h, m_p = b_tile * N_h, b_tile * N_p

    # hist_value = past_target_norm.transpose(1, 2)  -> [B, S, Th], series-major tokens.
    # Embedding computed lane-dense here so the kernel never sees a last-dim-1 tile:
    #   token[b, s*Th + t] = value[b, t, s] * wval + ser_emb[s] + pos_emb[t]
    hist = jnp.transpose(past_target_norm, (0, 2, 1)).reshape(B, N_h, 1).astype(jnp.float32)
    tokens = hist * params["wval"][None, None, :] + params["bias_h"][None]
    tokens = tokens.reshape(B * N_h, E).astype(jnp.bfloat16)

    noise = jax.random.normal(noise_key, (B * N_p, NS_PAD), dtype=jnp.float32)

    kernel = _make_kernel(b_tile, N_h, N_p, E)

    # Constant (grid-invariant) blocks; single-buffering them only matters once
    # E/F are scaled up (VMEM is tiny here), so default pipelining is kept.
    def const(shape):
        return pl.BlockSpec(shape, lambda g: (0,) * len(shape))

    out = pl.pallas_call(
        kernel,
        out_shape=jax.ShapeDtypeStruct((B * N_p, NS_PAD), jnp.float32),
        grid_spec=pltpu.PrefetchScalarGridSpec(
            num_scalar_prefetch=0,
            grid=(num_tiles,),
            in_specs=[
                pl.BlockSpec((m_h, E), lambda g: (g, 0)),       # history tokens
                pl.BlockSpec((m_p, NS_PAD), lambda g: (g, 0)),  # gaussian noise
                const((N_p, E)),      # prediction-token embeddings
                const((E, E)),        # wq
                const((E, E)),        # wk
                const((E, E)),        # wv
                const((E, E)),        # wo
                const((E, F)),        # w1
                const((F, E)),        # w2
                const((E, E)),        # wq2
                const((E, E)),        # wk2
                const((E, E)),        # wv2
                const((1, E)),        # w_mean
                const((1, E)),        # w_logstd
            ],
            out_specs=pl.BlockSpec((m_p, NS_PAD), lambda g: (g, 0)),
        ),
        compiler_params=pltpu.CompilerParams(
            dimension_semantics=("parallel",)),
    )(tokens, noise, params["ptok"],
      params["wq"], params["wk"], params["wv"], params["wo"],
      params["w1"], params["w2"],
      params["wq2"], params["wk2"], params["wv2"],
      params["wmean"], params["wlogstd"])

    # (B*N_p, NS_PAD) -> (B, S, Tp, NS) -> permute(0, 3, 2, 1) -> (B, NS, Tp, S)
    out = out.reshape(B, S, Tp, NS_PAD)[..., :NS]
    return jnp.transpose(out, (0, 3, 2, 1))


if __name__ == "__main__":
    # Small shapes consistent with the module's describe_inputs():
    #   past_target_norm: [batch, context_length, num_series]
    batch = 2
    num_series = 4
    context_length = 8
    prediction_length = 4
    num_parallel_samples = 8

    key = jax.random.PRNGKey(0)
    k_param, k_data, k_noise = jax.random.split(key, 3)

    params = make_params(k_param, num_series, context_length, prediction_length)
    past_target_norm = jax.random.normal(
        k_data, (batch, context_length, num_series), dtype=jnp.float32)

    samples = tactis_forward(
        past_target_norm, params,
        num_series=num_series,
        context_length=context_length,
        prediction_length=prediction_length,
        num_parallel_samples=num_parallel_samples,
        noise_key=k_noise,
    )
    samples = jax.block_until_ready(samples)

    expected = (batch, num_parallel_samples, prediction_length, num_series)
    assert samples.shape == expected, (samples.shape, expected)
    assert samples.dtype == jnp.float32
    assert bool(jnp.all(jnp.isfinite(samples)))
    print("KERNEL_OK")
</pallas_src>

<mosaic_0001>
module attributes {stable_mosaic.version = 11 : i64} {
  func.func @kernel(%arg0: i32, %arg1: memref<32x128xbf16, #tpu.memory_space<vmem>>, %arg2: memref<16x128xf32, #tpu.memory_space<vmem>>, %arg3: memref<16x128xbf16, #tpu.memory_space<vmem>>, %arg4: memref<128x128xbf16, #tpu.memory_space<vmem>>, %arg5: memref<128x128xbf16, #tpu.memory_space<vmem>>, %arg6: memref<128x128xbf16, #tpu.memory_space<vmem>>, %arg7: memref<128x128xbf16, #tpu.memory_space<vmem>>, %arg8: memref<128x256xbf16, #tpu.memory_space<vmem>>, %arg9: memref<256x128xbf16, #tpu.memory_space<vmem>>, %arg10: memref<128x128xbf16, #tpu.memory_space<vmem>>, %arg11: memref<128x128xbf16, #tpu.memory_space<vmem>>, %arg12: memref<128x128xbf16, #tpu.memory_space<vmem>>, %arg13: memref<1x128xf32, #tpu.memory_space<vmem>>, %arg14: memref<1x128xf32, #tpu.memory_space<vmem>>, %arg15: memref<16x128xf32, #tpu.memory_space<vmem>>) attributes {dimension_semantics = [#tpu.dimension_semantics<parallel>], iteration_bounds = array<i64: 2>, scalar_prefetch = 0 : i64, scratch_operands = 0 : i64, tpu.core_type = #tpu.core_type<tc>, window_params = [{transform_indices = @transform_0, window_bounds = array<i64: 32, 128>}, {transform_indices = @transform_1, window_bounds = array<i64: 16, 128>}, {pipeline_mode = #tpu.pipeline_mode<synchronous>, transform_indices = @transform_2, window_bounds = array<i64: 16, 128>}, {pipeline_mode = #tpu.pipeline_mode<synchronous>, transform_indices = @transform_3, window_bounds = array<i64: 128, 128>}, {pipeline_mode = #tpu.pipeline_mode<synchronous>, transform_indices = @transform_4, window_bounds = array<i64: 128, 128>}, {pipeline_mode = #tpu.pipeline_mode<synchronous>, transform_indices = @transform_5, window_bounds = array<i64: 128, 128>}, {pipeline_mode = #tpu.pipeline_mode<synchronous>, transform_indices = @transform_6, window_bounds = array<i64: 128, 128>}, {pipeline_mode = #tpu.pipeline_mode<synchronous>, transform_indices = @transform_7, window_bounds = array<i64: 128, 256>}, {pipeline_mode = #tpu.pipeline_mode<synchronous>, transform_indices = @transform_8, window_bounds = array<i64: 256, 128>}, {pipeline_mode = #tpu.pipeline_mode<synchronous>, transform_indices = @transform_9, window_bounds = array<i64: 128, 128>}, {pipeline_mode = #tpu.pipeline_mode<synchronous>, transform_indices = @transform_10, window_bounds = array<i64: 128, 128>}, {pipeline_mode = #tpu.pipeline_mode<synchronous>, transform_indices = @transform_11, window_bounds = array<i64: 128, 128>}, {pipeline_mode = #tpu.pipeline_mode<synchronous>, transform_indices = @transform_12, window_bounds = array<i64: 1, 128>}, {pipeline_mode = #tpu.pipeline_mode<synchronous>, transform_indices = @transform_13, window_bounds = array<i64: 1, 128>}, {transform_indices = @transform_14, window_bounds = array<i64: 16, 128>}]} {
    %c0 = arith.constant 0 : index
    %c0_0 = arith.constant 0 : index
    %0 = vector.load %arg1[%c0, %c0_0] : memref<32x128xbf16, #tpu.memory_space<vmem>>, vector<32x128xbf16>
    %1 = arith.extf %0 : vector<32x128xbf16> to vector<32x128xf32>
    %c0_1 = arith.constant 0 : index
    %c0_2 = arith.constant 0 : index
    %2 = vector.load %arg4[%c0_1, %c0_2] : memref<128x128xbf16, #tpu.memory_space<vmem>>, vector<128x128xbf16>
    %cst = arith.constant dense<0.000000e+00> : vector<32x128xf32>
    %3 = tpu.matmul %0, %2, %cst {dimension_numbers = #tpu.dot_dimension_numbers<[1], [0], [0], [1], [0, 0, 1, 1], [], []>} : vector<32x128xbf16>, vector<128x128xbf16>, vector<32x128xf32> -> vector<32x128xf32>
    %c0_3 = arith.constant 0 : index
    %c0_4 = arith.constant 0 : index
    %4 = vector.load %arg5[%c0_3, %c0_4] : memref<128x128xbf16, #tpu.memory_space<vmem>>, vector<128x128xbf16>
    %cst_5 = arith.constant dense<0.000000e+00> : vector<32x128xf32>
    %5 = tpu.matmul %0, %4, %cst_5 {dimension_numbers = #tpu.dot_dimension_numbers<[1], [0], [0], [1], [0, 0, 1, 1], [], []>} : vector<32x128xbf16>, vector<128x128xbf16>, vector<32x128xf32> -> vector<32x128xf32>
    %c0_6 = arith.constant 0 : index
    %c0_7 = arith.constant 0 : index
    %6 = vector.load %arg6[%c0_6, %c0_7] : memref<128x128xbf16, #tpu.memory_space<vmem>>, vector<128x128xbf16>
    %cst_8 = arith.constant dense<0.000000e+00> : vector<32x128xf32>
    %7 = tpu.matmul %0, %6, %cst_8 {dimension_numbers = #tpu.dot_dimension_numbers<[1], [0], [0], [1], [0, 0, 1, 1], [], []>} : vector<32x128xbf16>, vector<128x128xbf16>, vector<32x128xf32> -> vector<32x128xf32>
    %8 = vector.shape_cast %3 : vector<32x128xf32> to vector<1x32x128xf32>
    %9 = arith.truncf %8 : vector<1x32x128xf32> to vector<1x32x128xbf16>
    %10 = vector.shape_cast %5 : vector<32x128xf32> to vector<1x32x128xf32>
    %11 = arith.truncf %10 : vector<1x32x128xf32> to vector<1x32x128xbf16>
    %12 = vector.shape_cast %7 : vector<32x128xf32> to vector<1x32x128xf32>
    %13 = arith.truncf %12 : vector<1x32x128xf32> to vector<1x32x128xbf16>
    "tpu.trace_start"() <{level = 10 : i32, message = "bqd,bkd->bqk"}> : () -> ()
    %cst_9 = arith.constant dense<0.000000e+00> : vector<1x32x32xf32>
    %14 = tpu.matmul %9, %11, %cst_9 {dimension_numbers = #tpu.dot_dimension_numbers<[2], [2], [1], [1], [0, 0, 0, 1, 1, 1], [0], [0]>} : vector<1x32x128xbf16>, vector<1x32x128xbf16>, vector<1x32x32xf32> -> vector<1x32x32xf32>
    "tpu.trace_stop"() : () -> ()
    %cst_10 = arith.constant 0.0883883461 : f32
    %15 = vector.broadcast %cst_10 : f32 to vector<1x32x32xf32>
    %16 = arith.mulf %14, %15 : vector<1x32x32xf32>
    %cst_11 = arith.constant dense<0xFF800000> : vector<1x32xf32>
    %17 = vector.multi_reduction <maximumf>, %16, %cst_11 [2] : vector<1x32x32xf32> to vector<1x32xf32>
    %18 = vector.shape_cast %17 : vector<1x32xf32> to vector<1x32x1xf32>
    %19 = vector.broadcast %18 : vector<1x32x1xf32> to vector<1x32x32xf32>
    %20 = arith.subf %16, %19 : vector<1x32x32xf32>
    %21 = math.exp %20 : vector<1x32x32xf32>
    %cst_12 = arith.constant dense<0.000000e+00> : vector<1x32xf32>
    %22 = vector.multi_reduction <add>, %21, %cst_12 [2] : vector<1x32x32xf32> to vector<1x32xf32>
    %23 = vector.shape_cast %22 : vector<1x32xf32> to vector<1x32x1xf32>
    %24 = tpu.reciprocal %23 {approx = true} : vector<1x32x1xf32> -> vector<1x32x1xf32>
    %25 = vector.broadcast %24 : vector<1x32x1xf32> to vector<1x32x32xf32>
    %26 = arith.mulf %21, %25 : vector<1x32x32xf32>
    %27 = arith.truncf %26 : vector<1x32x32xf32> to vector<1x32x32xbf16>
    "tpu.trace_start"() <{level = 10 : i32, message = "bqk,bkd->bqd"}> : () -> ()
    %cst_13 = arith.constant dense<0.000000e+00> : vector<1x32x128xf32>
    %28 = tpu.matmul %27, %13, %cst_13 {dimension_numbers = #tpu.dot_dimension_numbers<[2], [1], [1], [2], [0, 0, 0, 1, 1, 2], [0], [0]>} : vector<1x32x32xbf16>, vector<1x32x128xbf16>, vector<1x32x128xf32> -> vector<1x32x128xf32>
    "tpu.trace_stop"() : () -> ()
    %29 = vector.shape_cast %28 : vector<1x32x128xf32> to vector<32x128xf32>
    %30 = arith.truncf %29 : vector<32x128xf32> to vector<32x128xbf16>
    %c0_14 = arith.constant 0 : index
    %c0_15 = arith.constant 0 : index
    %31 = vector.load %arg7[%c0_14, %c0_15] : memref<128x128xbf16, #tpu.memory_space<vmem>>, vector<128x128xbf16>
    %cst_16 = arith.constant dense<0.000000e+00> : vector<32x128xf32>
    %32 = tpu.matmul %30, %31, %cst_16 {dimension_numbers = #tpu.dot_dimension_numbers<[1], [0], [0], [1], [0, 0, 1, 1], [], []>} : vector<32x128xbf16>, vector<128x128xbf16>, vector<32x128xf32> -> vector<32x128xf32>
    %33 = arith.addf %1, %32 : vector<32x128xf32>
    %34 = arith.truncf %33 : vector<32x128xf32> to vector<32x128xbf16>
    %c0_17 = arith.constant 0 : index
    %c0_18 = arith.constant 0 : index
    %35 = vector.load %arg8[%c0_17, %c0_18] : memref<128x256xbf16, #tpu.memory_space<vmem>>, vector<128x256xbf16>
    %cst_19 = arith.constant dense<0.000000e+00> : vector<32x256xf32>
    %36 = tpu.matmul %34, %35, %cst_19 {dimension_numbers = #tpu.dot_dimension_numbers<[1], [0], [0], [1], [0, 0, 1, 1], [], []>} : vector<32x128xbf16>, vector<128x256xbf16>, vector<32x256xf32> -> vector<32x256xf32>
    %cst_20 = arith.constant 0.000000e+00 : f32
    %37 = vector.broadcast %cst_20 : f32 to vector<32x256xf32>
    %38 = arith.maximumf %36, %37 : vector<32x256xf32>
    %39 = arith.truncf %38 : vector<32x256xf32> to vector<32x256xbf16>
    %c0_21 = arith.constant 0 : index
    %c0_22 = arith.constant 0 : index
    %40 = vector.load %arg9[%c0_21, %c0_22] : memref<256x128xbf16, #tpu.memory_space<vmem>>, vector<256x128xbf16>
    %cst_23 = arith.constant dense<0.000000e+00> : vector<32x128xf32>
    %41 = tpu.matmul %39, %40, %cst_23 {dimension_numbers = #tpu.dot_dimension_numbers<[1], [0], [0], [1], [0, 0, 1, 1], [], []>} : vector<32x256xbf16>, vector<256x128xbf16>, vector<32x128xf32> -> vector<32x128xf32>
    %42 = arith.addf %33, %41 : vector<32x128xf32>
    %43 = arith.truncf %42 : vector<32x128xf32> to vector<32x128xbf16>
    %c0_24 = arith.constant 0 : index
    %c0_25 = arith.constant 0 : index
    %44 = vector.load %arg3[%c0_24, %c0_25] : memref<16x128xbf16, #tpu.memory_space<vmem>>, vector<16x128xbf16>
    %c0_26 = arith.constant 0 : index
    %c0_27 = arith.constant 0 : index
    %45 = vector.load %arg10[%c0_26, %c0_27] : memref<128x128xbf16, #tpu.memory_space<vmem>>, vector<128x128xbf16>
    %cst_28 = arith.constant dense<0.000000e+00> : vector<16x128xf32>
    %46 = tpu.matmul %44, %45, %cst_28 {dimension_numbers = #tpu.dot_dimension_numbers<[1], [0], [0], [1], [0, 0, 1, 1], [], []>} : vector<16x128xbf16>, vector<128x128xbf16>, vector<16x128xf32> -> vector<16x128xf32>
    %47 = arith.truncf %46 : vector<16x128xf32> to vector<16x128xbf16>
    %48 = vector.shape_cast %47 : vector<16x128xbf16> to vector<1x16x128xbf16>
    %c0_29 = arith.constant 0 : index
    %c0_30 = arith.constant 0 : index
    %49 = vector.load %arg11[%c0_29, %c0_30] : memref<128x128xbf16, #tpu.memory_space<vmem>>, vector<128x128xbf16>
    %cst_31 = arith.constant dense<0.000000e+00> : vector<32x128xf32>
    %50 = tpu.matmul %43, %49, %cst_31 {dimension_numbers = #tpu.dot_dimension_numbers<[1], [0], [0], [1], [0, 0, 1, 1], [], []>} : vector<32x128xbf16>, vector<128x128xbf16>, vector<32x128xf32> -> vector<32x128xf32>
    %51 = vector.shape_cast %50 : vector<32x128xf32> to vector<1x32x128xf32>
    %c0_32 = arith.constant 0 : index
    %c0_33 = arith.constant 0 : index
    %52 = vector.load %arg12[%c0_32, %c0_33] : memref<128x128xbf16, #tpu.memory_space<vmem>>, vector<128x128xbf16>
    %cst_34 = arith.constant dense<0.000000e+00> : vector<32x128xf32>
    %53 = tpu.matmul %43, %52, %cst_34 {dimension_numbers = #tpu.dot_dimension_numbers<[1], [0], [0], [1], [0, 0, 1, 1], [], []>} : vector<32x128xbf16>, vector<128x128xbf16>, vector<32x128xf32> -> vector<32x128xf32>
    %54 = vector.shape_cast %53 : vector<32x128xf32> to vector<1x32x128xf32>
    %55 = arith.truncf %51 : vector<1x32x128xf32> to vector<1x32x128xbf16>
    "tpu.trace_start"() <{level = 10 : i32, message = "bqd,bkd->bqk"}> : () -> ()
    %cst_35 = arith.constant dense<0.000000e+00> : vector<1x16x32xf32>
    %56 = tpu.matmul %48, %55, %cst_35 {dimension_numbers = #tpu.dot_dimension_numbers<[2], [2], [1], [1], [0, 0, 0, 1, 1, 1], [0], [0]>} : vector<1x16x128xbf16>, vector<1x32x128xbf16>, vector<1x16x32xf32> -> vector<1x16x32xf32>
    "tpu.trace_stop"() : () -> ()
    %cst_36 = arith.constant 0.0883883461 : f32
    %57 = vector.broadcast %cst_36 : f32 to vector<1x16x32xf32>
    %58 = arith.mulf %56, %57 : vector<1x16x32xf32>
    %cst_37 = arith.constant dense<0xFF800000> : vector<1x16xf32>
    %59 = vector.multi_reduction <maximumf>, %58, %cst_37 [2] : vector<1x16x32xf32> to vector<1x16xf32>
    %60 = vector.shape_cast %59 : vector<1x16xf32> to vector<1x16x1xf32>
    %61 = vector.broadcast %60 : vector<1x16x1xf32> to vector<1x16x32xf32>
    %62 = arith.subf %58, %61 : vector<1x16x32xf32>
    %63 = math.exp %62 : vector<1x16x32xf32>
    %cst_38 = arith.constant dense<0.000000e+00> : vector<1x16xf32>
    %64 = vector.multi_reduction <add>, %63, %cst_38 [2] : vector<1x16x32xf32> to vector<1x16xf32>
    %65 = vector.shape_cast %64 : vector<1x16xf32> to vector<1x16x1xf32>
    %66 = tpu.reciprocal %65 {approx = true} : vector<1x16x1xf32> -> vector<1x16x1xf32>
    %67 = vector.broadcast %66 : vector<1x16x1xf32> to vector<1x16x32xf32>
    %68 = arith.mulf %63, %67 : vector<1x16x32xf32>
    %69 = arith.truncf %68 : vector<1x16x32xf32> to vector<1x16x32xbf16>
    %70 = arith.truncf %54 : vector<1x32x128xf32> to vector<1x32x128xbf16>
    "tpu.trace_start"() <{level = 10 : i32, message = "bqk,bkd->bqd"}> : () -> ()
    %cst_39 = arith.constant dense<0.000000e+00> : vector<1x16x128xf32>
    %71 = tpu.matmul %69, %70, %cst_39 {dimension_numbers = #tpu.dot_dimension_numbers<[2], [1], [1], [2], [0, 0, 0, 1, 1, 2], [0], [0]>} : vector<1x16x32xbf16>, vector<1x32x128xbf16>, vector<1x16x128xf32> -> vector<1x16x128xf32>
    "tpu.trace_stop"() : () -> ()
    %72 = vector.shape_cast %71 : vector<1x16x128xf32> to vector<16x128xf32>
    %c0_40 = arith.constant 0 : index
    %c0_41 = arith.constant 0 : index
    %73 = vector.load %arg13[%c0_40, %c0_41] : memref<1x128xf32, #tpu.memory_space<vmem>>, vector<1x128xf32>
    %74 = vector.broadcast %73 : vector<1x128xf32> to vector<16x128xf32>
    %75 = arith.mulf %72, %74 : vector<16x128xf32>
    %cst_42 = arith.constant dense<0.000000e+00> : vector<16xf32>
    %76 = vector.multi_reduction <add>, %75, %cst_42 [1] : vector<16x128xf32> to vector<16xf32>
    %77 = vector.shape_cast %76 : vector<16xf32> to vector<16x1xf32>
    %c0_43 = arith.constant 0 : index
    %c0_44 = arith.constant 0 : index
    %78 = vector.load %arg14[%c0_43, %c0_44] : memref<1x128xf32, #tpu.memory_space<vmem>>, vector<1x128xf32>
    %79 = vector.broadcast %78 : vector<1x128xf32> to vector<16x128xf32>
    %80 = arith.mulf %72, %79 : vector<16x128xf32>
    %cst_45 = arith.constant dense<0.000000e+00> : vector<16xf32>
    %81 = vector.multi_reduction <add>, %80, %cst_45 [1] : vector<16x128xf32> to vector<16xf32>
    %82 = vector.shape_cast %81 : vector<16xf32> to vector<16x1xf32>
    %cst_46 = arith.constant -1.500000e+01 : f32
    %cst_47 = arith.constant 1.500000e+01 : f32
    %83 = vector.broadcast %cst_46 : f32 to vector<16x1xf32>
    %84 = arith.maximumf %83, %82 : vector<16x1xf32>
    %85 = vector.broadcast %cst_47 : f32 to vector<16x1xf32>
    %86 = arith.minimumf %85, %84 : vector<16x1xf32>
    %87 = math.exp %86 : vector<16x1xf32>
    %c0_48 = arith.constant 0 : index
    %c0_49 = arith.constant 0 : index
    %88 = vector.load %arg2[%c0_48, %c0_49] : memref<16x128xf32, #tpu.memory_space<vmem>>, vector<16x128xf32>
    %89 = vector.broadcast %87 : vector<16x1xf32> to vector<16x128xf32>
    %90 = arith.mulf %89, %88 : vector<16x128xf32>
    %91 = vector.broadcast %77 : vector<16x1xf32> to vector<16x128xf32>
    %92 = arith.addf %91, %90 : vector<16x128xf32>
    %c0_50 = arith.constant 0 : index
    %c0_51 = arith.constant 0 : index
    %93 = vector.load %arg15[%c0_50, %c0_51] : memref<16x128xf32, #tpu.memory_space<vmem>>, vector<16x128xf32>
    tpu.vector_store %arg15[%c0_50, %c0_51], %92 {strides = array<i32>} : memref<16x128xf32, #tpu.memory_space<vmem>>, vector<16x128xf32>,
    return
  }
  func.func @transform_0(%arg0: i32) -> (i32, i32) {
    %c0_i32 = arith.constant 0 : i32
    %c0_i32_0 = arith.constant 0 : i32
    return %arg0, %c0_i32 : i32, i32
  }
  func.func @transform_1(%arg0: i32) -> (i32, i32) {
    %c0_i32 = arith.constant 0 : i32
    %c0_i32_0 = arith.constant 0 : i32
    return %arg0, %c0_i32 : i32, i32
  }
  func.func @transform_2(%arg0: i32) -> (i32, i32) {
    %c0_i32 = arith.constant 0 : i32
    %c0_i32_0 = arith.constant 0 : i32
    %c0_i32_1 = arith.constant 0 : i32
    return %c0_i32, %c0_i32_0 : i32, i32
  }
  func.func @transform_3(%arg0: i32) -> (i32, i32) {
    %c0_i32 = arith.constant 0 : i32
    %c0_i32_0 = arith.constant 0 : i32
    %c0_i32_1 = arith.constant 0 : i32
    return %c0_i32, %c0_i32_0 : i32, i32
  }
  func.func @transform_4(%arg0: i32) -> (i32, i32) {
    %c0_i32 = arith.constant 0 : i32
    %c0_i32_0 = arith.constant 0 : i32
    %c0_i32_1 = arith.constant 0 : i32
    return %c0_i32, %c0_i32_0 : i32, i32
  }
  func.func @transform_5(%arg0: i32) -> (i32, i32) {
    %c0_i32 = arith.constant 0 : i32
    %c0_i32_0 = arith.constant 0 : i32
    %c0_i32_1 = arith.constant 0 : i32
    return %c0_i32, %c0_i32_0 : i32, i32
  }
  func.func @transform_6(%arg0: i32) -> (i32, i32) {
    %c0_i32 = arith.constant 0 : i32
    %c0_i32_0 = arith.constant 0 : i32
    %c0_i32_1 = arith.constant 0 : i32
    return %c0_i32, %c0_i32_0 : i32, i32
  }
  func.func @transform_7(%arg0: i32) -> (i32, i32) {
    %c0_i32 = arith.constant 0 : i32
    %c0_i32_0 = arith.constant 0 : i32
    %c0_i32_1 = arith.constant 0 : i32
    return %c0_i32, %c0_i32_0 : i32, i32
  }
  func.func @transform_8(%arg0: i32) -> (i32, i32) {
    %c0_i32 = arith.constant 0 : i32
    %c0_i32_0 = arith.constant 0 : i32
    %c0_i32_1 = arith.constant 0 : i32
    return %c0_i32, %c0_i32_0 : i32, i32
  }
  func.func @transform_9(%arg0: i32) -> (i32, i32) {
    %c0_i32 = arith.constant 0 : i32
    %c0_i32_0 = arith.constant 0 : i32
    %c0_i32_1 = arith.constant 0 : i32
    return %c0_i32, %c0_i32_0 : i32, i32
  }
  func.func @transform_10(%arg0: i32) -> (i32, i32) {
    %c0_i32 = arith.constant 0 : i32
    %c0_i32_0 = arith.constant 0 : i32
    %c0_i32_1 = arith.constant 0 : i32
    return %c0_i32, %c0_i32_0 : i32, i32
  }
  func.func @transform_11(%arg0: i32) -> (i32, i32) {
    %c0_i32 = arith.constant 0 : i32
    %c0_i32_0 = arith.constant 0 : i32
    %c0_i32_1 = arith.constant 0 : i32
    return %c0_i32, %c0_i32_0 : i32, i32
  }
  func.func @transform_12(%arg0: i32) -> (i32, i32) {
    %c0_i32 = arith.constant 0 : i32
    %c0_i32_0 = arith.constant 0 : i32
    %c0_i32_1 = arith.constant 0 : i32
    return %c0_i32, %c0_i32_0 : i32, i32
  }
  func.func @transform_13(%arg0: i32) -> (i32, i32) {
    %c0_i32 = arith.constant 0 : i32
    %c0_i32_0 = arith.constant 0 : i32
    %c0_i32_1 = arith.constant 0 : i32
    return %c0_i32, %c0_i32_0 : i32, i32
  }
  func.func @transform_14(%arg0: i32) -> (i32, i32) {
    %c0_i32 = arith.constant 0 : i32
    %c0_i32_0 = arith.constant 0 : i32
    return %arg0, %c0_i32 : i32, i32
  }
}

</mosaic_0001>

<bundles_post_ra>
// kernel: tpu_custom_call.1
= control target key start
LH: loop header
LB: loop body
LE: loop exit
PB: predicated region body
PF: predicated region fallthrough
CT: control target
= control target key end

     0   :  { %s4026_s0 = inlined_call_operand.hbm [shape: bf16[64,128], index: 0, kind: input, shape index: {}]   ;;  %s4027_s1 = inlined_call_operand.hbm [shape: f32[32,128], index: 1, kind: input, shape index: {}]   ;;  %s4028_s2 = inlined_call_operand.hbm [shape: bf16[16,128], index: 2, kind: input, shape index: {}]   ;;  %s4029_s3 = inlined_call_operand.hbm [shape: bf16[128,128], index: 3, kind: input, shape index: {}]   ;;  %s4030_s4 = inlined_call_operand.hbm [shape: bf16[128,128], index: 4, kind: input, shape index: {}]   ;;  %s4031_s5 = inlined_call_operand.hbm [shape: bf16[128,128], index: 5, kind: input, shape index: {}]   ;;  %s4032_s6 = inlined_call_operand.hbm [shape: bf16[128,128], index: 6, kind: input, shape index: {}]   ;;  %s4033_s7 = inlined_call_operand.hbm [shape: bf16[128,256], index: 7, kind: input, shape index: {}]   ;;  %s4034_s8 = inlined_call_operand.hbm [shape: bf16[256,128], index: 8, kind: input, shape index: {}]   ;;  %s4035_s9 = inlined_call_operand.hbm [shape: bf16[128,128], index: 9, kind: input, shape index: {}]   ;;  %s4036_s10 = inlined_call_operand.hbm [shape: bf16[128,128], index: 10, kind: input, shape index: {}]   ;;  %s4037_s11 = inlined_call_operand.hbm [shape: bf16[128,128], index: 11, kind: input, shape index: {}]   ;;  %s4038_s12 = inlined_call_operand.vmem [shape: f32[1,128], index: 12, kind: input, shape index: {}]   ;;  %s4039_s13 = inlined_call_operand.vmem [shape: f32[1,128], index: 13, kind: input, shape index: {}]   ;;  %s4040_s14 = inlined_call_operand.hbm [shape: f32[32,128], index: 14, kind: output, shape index: {}]  }
   0x1   :  { %4051 = sst [smem:[#allocation33_spill]] %s4028_s2 }
   0x2   :  { %4052 = sst [smem:[#allocation34_spill]] %s4029_s3 }
   0x3   :  { %4053 = sst [smem:[#allocation35_spill]] %s4030_s4 }
   0x4   :  { %4054 = sst [smem:[#allocation36_spill]] %s4031_s5 }
   0x5   :  { %4055 = sst [smem:[#allocation37_spill]] %s4032_s6 }
   0x6   :  { %4056 = sst [smem:[#allocation38_spill]] %s4033_s7 }
   0x7   :  { %4057 = sst [smem:[#allocation39_spill]] %s4034_s8 }
   0x8   :  { %4058 = sst [smem:[#allocation40_spill]] %s4035_s9 }
   0x9   :  { %4059 = sst [smem:[#allocation41_spill]] %s4036_s10 }
   0xa   :  { %4060 = sst [smem:[#allocation42_spill]] %s4037_s11 }
   0xb   :  { %4061 = sst [smem:[#allocation43_spill]] %s4040_s14 }
   0xc   :  { %19 = vsyncpa [#allocation3], 0 }
   0xd   :  { %21 = vsyncpa [#allocation3 + $0x1], 0 }
   0xe   :  { %22 = vsyncpa [#allocation6], 0 }
   0xf   :  { %24 = vsyncpa [#allocation6 + $0x1], 0 }
  0x10   :  { %25 = vsyncpa [#allocation9], 0 }
  0x11   :  { %26 = vsyncpa [#allocation12], 0 }
  0x12   :  { %27 = vsyncpa [#allocation15], 0 }
  0x13   :  { %28 = vsyncpa [#allocation18], 0 }
  0x14   :  { %29 = vsyncpa [#allocation21], 0 }
  0x15   :  { %30 = vsyncpa [#allocation4], 0 }
  0x16   :  { %32 = vsyncpa [#allocation4 + $0x1], 0  ;;  %s3580_s29 = smov 0   ;;  %s3582_s30 = smov 0  }
  0x17   :  { %s3584_s15 = smov 0   ;;  %s3586_s16 = smov 0  }
  0x18 LB: > { %s3483_s17 = smov [#allocation7]   ;;  %s3601_s19 = sadd.s32 4294967295, %s3481_s16   ;;  %s3481_s16 = sphi %s3586_s16, %s4106_s16   ;;  %s3477_s15 = sphi %s3584_s15, %s4105_s15   ;;  %s3473_s30 = sphi %s3582_s30, %s4104_s30   ;;  %s3469_s29 = sphi %s3580_s29, %s4103_s29  }
  0x19   : > { %s385_s18 = sshll.u32 %s3483_s17, 4  ;;  %p2362_p0 = scmp.ge.s32.totalorder %s3481_s16, 1  ;;  %s386_s18 = int_to_ptr.vmem [resolvable:$true] %s385_s18 }
  0x1a   : > { %p4048_p1 = scmp.eq.s32.totalorder %s3601_s19, 0  ;;  %p373_p2 = scmp.lt.s32.totalorder %s3481_s16, 3 }
  0x1b   : > { %s3484_s21 = smov [#allocation8]   ;;  %s3485_s24 = smov [#allocation11]  }
  0x1c   : > { %p3606_p3 = pnand %p2362_p0, %p373_p2  ;;  %s398_s22 = sshll.u32 %s3484_s21, 4  ;;  %s3619_s22 = int_to_ptr.vmem [resolvable:$true] %s398_s22 }
  0x1d   : > { %s424_s25 = sshll.u32 %s3485_s24, 4  ;;  %s3084_s27 = scalar_lea.vmem %s386_s18, 128  ;;  %s3621_s25 = int_to_ptr.vmem [resolvable:$true] %s424_s25 }
  0x1e   : > { %p2829_p5 = pneg %p3606_p3  ;;  %p3085_p8 = scmp.ne.s32.totalorder %s386_s18, %s3084_s27 }
  0x1f   : > { %p3092_p11 = scmp.lt.s32.totalorder %s386_s18, %s386_s18  ;;  %p3093_p12 = scmp.lt.s32.totalorder %s3084_s27, %s3084_s27 }
  0x20   : > { %p3615_p6 = pnand %p2829_p5, %p4048_p1 }
  0x21   : > { %p3094_p13 = por %p3093_p12, %p3092_p11 }
  0x22   : > { %p3625_p7 = pneg %p3615_p6 }
  0x24   : > { %p3087_p9 = pnand %p3085_p8, %p3625_p7 }
  0x26   : > { %p3088_p10 = pneg %p3087_p9 }
  0x28   : > { %p3095_p0 = pnand %p3094_p13, %p3088_p10 }
  0x2a   : > { %3098 = shalt.err (!%p3095_p0)
}
  0x2b   : > { %s4042_s28 = smov 64   ;;  %s4044_s17 = smov 4  }
  0x2c   : > { %s4065_s2 = sld [smem:[#allocation33_spill]]  ;;  %s3110_s14 = scalar_lea.vmem %s3619_s22, 1024 }
  0x2d   : > { %p3111_p2 = scmp.ne.s32.totalorder %s3619_s22, %s3110_s14  ;;  %p3118_p9 = scmp.lt.s32.totalorder %s3619_s22, %s3619_s22 }
  0x2e   : > { %p3119_p10 = scmp.lt.s32.totalorder %s3110_s14, %s3110_s14 }
  0x2f   : > { %p3113_p5 = pnand %p3111_p2, %p3625_p7 }
  0x30   : > { %p3120_p11 = por %p3119_p10, %p3118_p9 }
  0x31   : > { %p3114_p8 = pneg %p3113_p5 }
  0x32   : > { %2832 = dma.hbm_to_vmem [thread:$0]  (!%p3615_p6), %s4065_s2, 128, %s386_s18, [#allocation6], %s4042_s28, %s4042_s28, %s4044_s17  }
  0x33   : > { %p3121_p12 = pnand %p3120_p11, %p3114_p8 }
  0x35   : > { %3124 = shalt.err (!%p3121_p12)
}
  0x36   : > { %s4066_s3 = sld [smem:[#allocation34_spill]]  ;;  %s3136_s18 = scalar_lea.vmem %s3621_s25, 1024 }
  0x37   : > { %p3137_p13 = scmp.ne.s32.totalorder %s3621_s25, %s3136_s18  ;;  %p3144_p5 = scmp.lt.s32.totalorder %s3621_s25, %s3621_s25 }
  0x38   : > { %p3145_p8 = scmp.lt.s32.totalorder %s3136_s18, %s3136_s18 }
  0x39   : > { %p3139_p0 = pnand %p3137_p13, %p3625_p7 }
  0x3a   : > { %p3146_p9 = por %p3145_p8, %p3144_p5 }
  0x3b   : > { %p3140_p2 = pneg %p3139_p0 }
  0x3c   : > { %2835 = dma.hbm_to_vmem [thread:$0]  (!%p3615_p6), %s4066_s3, 1024, %s3619_s22, [#allocation9], %s4042_s28, %s4042_s28, %s4044_s17  }
  0x3d   : > { %p3147_p10 = pnand %p3146_p9, %p3140_p2 }
  0x3f   : > { %3150 = shalt.err (!%p3147_p10)
}
  0x40   : > { %s4067_s5 = sld [smem:[#allocation36_spill]]  ;;  %s3488_s22 = smov [#allocation14]  }
  0x41   : > { %s450_s27 = sshll.u32 %s3488_s22, 4  ;;  %s451_s27 = int_to_ptr.vmem [resolvable:$true] %s450_s27 }
  0x42   : > { %s3162_s21 = scalar_lea.vmem %s451_s27, 2048  ;;  %p3170_p0 = scmp.lt.s32.totalorder %s451_s27, %s451_s27 }
  0x43   : > { %p3163_p11 = scmp.ne.s32.totalorder %s451_s27, %s3162_s21  ;;  %p3171_p2 = scmp.lt.s32.totalorder %s3162_s21, %s3162_s21 }
  0x45   : > { %p3165_p12 = pnand %p3163_p11, %p3625_p7  ;;  %p3172_p5 = por %p3171_p2, %p3170_p0 }
  0x46   : > { %2841 = dma.hbm_to_vmem [thread:$0]  (!%p3615_p6), %s4067_s5, 1024, %s3621_s25, [#allocation12], %s4042_s28, %s4042_s28, %s4044_s17  }
  0x47   : > { %p3166_p13 = pneg %p3165_p12 }
  0x49   : > { %p3173_p8 = pnand %p3172_p5, %p3166_p13 }
  0x4b   : > { %3176 = shalt.err (!%p3173_p8)
}
  0x4c   : > { %s4046_s18 = smov 128   ;;  %s4047_s2 = smov 8  }
  0x4d   : > { %s4068_s7 = sld [smem:[#allocation38_spill]]  ;;  %s3491_s24 = smov [#allocation17]  }
  0x4e   : > { %s476_s22 = sshll.u32 %s3491_s24, 4  ;;  %s3492_s28 = smov [#allocation10]   ;;  %s477_s22 = int_to_ptr.vmem [resolvable:$true] %s476_s22 }
  0x4f   : > { %s411_s17 = sshll.u32 %s3492_s28, 4  ;;  %s3188_s21 = scalar_lea.vmem %s477_s22, 1024  ;;  %s412_s17 = int_to_ptr.vmem [resolvable:$true] %s411_s17 }
  0x50   : > { %p3189_p9 = scmp.ne.s32.totalorder %s477_s22, %s3188_s21  ;;  %p3196_p12 = scmp.lt.s32.totalorder %s477_s22, %s477_s22 }
  0x51   : > { %p3197_p13 = scmp.lt.s32.totalorder %s3188_s21, %s3188_s21 }
  0x52   : > { %p3191_p10 = pnand %p3189_p9, %p3625_p7 }
  0x53   : > { %2847 = dma.hbm_to_vmem [thread:$0]  (!%p3615_p6), %s4068_s7, 2048, %s451_s27, [#allocation15], %s4046_s18, %s4046_s18, %s4047_s2  }
  0x54   : > { %p3192_p11 = pneg %p3191_p10  ;;  %p3198_p0 = por %p3197_p13, %p3196_p12 }
  0x56   : > { %p3199_p2 = pnand %p3198_p0, %p3192_p11 }
  0x58   : > { %3202 = shalt.err (!%p3199_p2)
}
  0x59   : > { %s4069_s25 = smov 4   ;;  %s4070_s27 = smov 64  }
  0x5a   : > { %s4071_s9 = sld [smem:[#allocation40_spill]]  ;;  %s3214_s28 = scalar_lea.vmem %s412_s17, 1024 }
  0x5b   : > { %p3215_p5 = scmp.ne.s32.totalorder %s412_s17, %s3214_s28  ;;  %p3222_p10 = scmp.lt.s32.totalorder %s412_s17, %s412_s17 }
  0x5c   : > { %p3223_p4 = scmp.lt.s32.totalorder %s3214_s28, %s3214_s28 }
  0x5d   : > { %p3217_p8 = pnand %p3215_p5, %p3625_p7 }
  0x5e   : > { %p3224_p12 = por %p3223_p4, %p3222_p10 }
  0x5f   : > { %p3218_p9 = pneg %p3217_p8 }
  0x60   : > { %2853 = dma.hbm_to_vmem [thread:$0]  (!%p3615_p6), %s4071_s9, 1024, %s477_s22, [#allocation18], %s4070_s27, %s4070_s27, %s4069_s25  }
  0x61   : > { %p3225_p11 = pnand %p3224_p12, %p3218_p9 }
  0x63   : > { %3228 = shalt.err (!%p3225_p11)
}
  0x64   : > { %s4072_s4 = sld [smem:[#allocation35_spill]]  ;;  %s3493_s22 = smov [#allocation13]  }
  0x65   : > { %s437_s14 = sshll.u32 %s3493_s22, 4  ;;  %s3494_s24 = smov [#allocation16]   ;;  %s438_s14 = int_to_ptr.vmem [resolvable:$true] %s437_s14 }
  0x66   : > { %s463_s2 = sshll.u32 %s3494_s24, 4  ;;  %s3240_s28 = scalar_lea.vmem %s438_s14, 1024  ;;  %s464_s2 = int_to_ptr.vmem [resolvable:$true] %s463_s2 }
  0x67   : > { %p3241_p4 = scmp.ne.s32.totalorder %s438_s14, %s3240_s28  ;;  %p3248_p2 = scmp.lt.s32.totalorder %s438_s14, %s438_s14 }
  0x68   : > { %p3249_p5 = scmp.lt.s32.totalorder %s3240_s28, %s3240_s28 }
  0x69   : > { %p3243_p13 = pnand %p3241_p4, %p3625_p7 }
  0x6a   : > { %2838 = dma.hbm_to_vmem [thread:$0]  (!%p3615_p6), %s4072_s4, 1024, %s412_s17, [#allocation9], %s4070_s27, %s4070_s27, %s4069_s25  }
  0x6b   : > { %p3244_p0 = pneg %p3243_p13  ;;  %p3250_p8 = por %p3249_p5, %p3248_p2 }
  0x6d   : > { %p3251_p9 = pnand %p3250_p8, %p3244_p0 }
  0x6f   : > { %3254 = shalt.err (!%p3251_p9)
}
  0x70   : > { %s4073_s6 = sld [smem:[#allocation37_spill]]  ;;  %s3266_s21 = scalar_lea.vmem %s464_s2, 2048 }
  0x71   : > { %p3267_p10 = scmp.ne.s32.totalorder %s464_s2, %s3266_s21  ;;  %p3274_p4 = scmp.lt.s32.totalorder %s464_s2, %s464_s2 }
  0x72   : > { %p3275_p13 = scmp.lt.s32.totalorder %s3266_s21, %s3266_s21 }
  0x73   : > { %p3269_p12 = pnand %p3267_p10, %p3625_p7 }
  0x74   : > { %p3276_p2 = por %p3275_p13, %p3274_p4 }
  0x75   : > { %p3270_p11 = pneg %p3269_p12 }
  0x76   : > { %2844 = dma.hbm_to_vmem [thread:$0]  (!%p3615_p6), %s4073_s6, 1024, %s438_s14, [#allocation12], %s4070_s27, %s4070_s27, %s4069_s25  }
  0x77   : > { %p3277_p0 = pnand %p3276_p2, %p3270_p11 }
  0x79   : > { %3280 = shalt.err (!%p3277_p0)
}
  0x7a   : > { %s4074_s8 = sld [smem:[#allocation39_spill]]  ;;  %s3495_s14 = smov [#allocation19]  }
  0x7b   : > { %s489_s28 = sshll.u32 %s3495_s14, 4  ;;  %s3496_s17 = smov [#allocation20]   ;;  %s490_s28 = int_to_ptr.vmem [resolvable:$true] %s489_s28 }
  0x7c   : > { %s502_s18 = sshll.u32 %s3496_s17, 4  ;;  %s3292_s21 = scalar_lea.vmem %s490_s28, 1024  ;;  %s503_s18 = int_to_ptr.vmem [resolvable:$true] %s502_s18 }
  0x7d   : > { %p3293_p5 = scmp.ne.s32.totalorder %s490_s28, %s3292_s21  ;;  %p3300_p10 = scmp.lt.s32.totalorder %s490_s28, %s490_s28 }
  0x7e   : > { %p3301_p12 = scmp.lt.s32.totalorder %s3292_s21, %s3292_s21 }
  0x7f   : > { %p3295_p8 = pnand %p3293_p5, %p3625_p7 }
  0x80   : > { %2850 = dma.hbm_to_vmem [thread:$0]  (!%p3615_p6), %s4074_s8, 2048, %s464_s2, [#allocation15], %s4070_s27, %s4070_s27, %s4069_s25  }
  0x81   : > { %p3296_p9 = pneg %p3295_p8  ;;  %p3302_p11 = por %p3301_p12, %p3300_p10 }
  0x83   : > { %p3303_p4 = pnand %p3302_p11, %p3296_p9 }
  0x85   : > { %3306 = shalt.err (!%p3303_p4)
}
  0x86   : > { %s4075_s10 = sld [smem:[#allocation41_spill]]  ;;  %s3318_s24 = scalar_lea.vmem %s503_s18, 1024 }
  0x87   : > { %p3319_p13 = scmp.ne.s32.totalorder %s503_s18, %s3318_s24  ;;  %p3326_p5 = scmp.lt.s32.totalorder %s503_s18, %s503_s18 }
  0x88   : > { %p3327_p8 = scmp.lt.s32.totalorder %s3318_s24, %s3318_s24 }
  0x89   : > { %p3321_p2 = pnand %p3319_p13, %p3625_p7 }
  0x8a   : > { %p3328_p10 = por %p3327_p8, %p3326_p5 }
  0x8b   : > { %p3322_p0 = pneg %p3321_p2 }
  0x8c   : > { %2856 = dma.hbm_to_vmem [thread:$0]  (!%p3615_p6), %s4075_s10, 1024, %s490_s28, [#allocation18], %s4070_s27, %s4070_s27, %s4069_s25  }
  0x8d   : > { %p3329_p9 = pnand %p3328_p10, %p3322_p0 }
  0x8f   : > { %3332 = shalt.err (!%p3329_p9)
}
  0x90   : > { %s4076_s11 = sld [smem:[#allocation42_spill]]  ;;  %s2361_s23 = sadd.s32 4294967294, %s3481_s16  }
  0x91   : > { %s3741_s26 = sadd.s32 1, %s3481_s16   ;;  %s45_s21 = sadd.s32 1, %s3477_s15 }
  0x92   : > { %s42_s28 = ssub.s32 %s3481_s16, %s3741_s26  ;;  %p52_p12 = scmp.ne.s32.totalorder %s3477_s15, %s3473_s30 }
  0x93   : > { %p43_p7 = scmp.eq.s32.totalorder %s42_s28, 0  ;;  %p53_p11 = scmp.eq.s32.totalorder %s3481_s16, 0 }
  0x94   : > { %p58_p4 = scmp.ne.s32.totalorder %s3473_s30, %s3469_s29  ;;  %p360_p2 = scmp.eq.s32.totalorder %s3601_s19, 1 }
  0x95   : > { %s3752_s2 = scalar_select %p43_p7, %s3477_s15, %s45_s21  }
  0x96   : > { %2859 = dma.hbm_to_vmem [thread:$0]  (!%p3615_p6), %s4076_s11, 1024, %s503_s18, [#allocation21], %s4070_s27, %s4070_s27, %s4069_s25  }
  0x97   : > { %4077 = sst [smem:[#allocation32_spill]] %s3752_s2  ;;  %p3754_p13 = por %p53_p11, %p52_p12 }
  0x98   : > { %p3760_p6 = por %p4048_p1, %p58_p4  ;;  %p366_p0 = scmp.eq.s32.totalorder %s2361_s23, 1 }
  0x99   : > { %p2881_p5 = scmp.lt.s32.totalorder %s3481_s16, 2  ;;  %s522_s24 = sand.u32 1, %s3477_s15  }
  0x9a   : > { %s4079_s18 = scalar_select %p3760_p6, 1, 0 }
  0x9b   : > { %p3767_p8 = por %p360_p2, %p52_p12  ;;  %p3771_p10 = por %p366_p0, %p58_p4 }
  0x9c   : > { %s2374_s28 = sshll.u32 %s522_s24, 4  ;;  %s2497_s21 = sshll.u32 %s3481_s16, 8 }
  0x9d   : > { %s4080_s14 = scalar_select %p3767_p8, 1, 0 }
  0x9e   : > { %s4081_s17 = scalar_select %p3771_p10, 1, 0 }
  0x9f   : > { %s3779_s5 = scalar_lea.hbm %s4026_s0, %s2497_s21  ;;  %s526_s23 = scalar_lea.vmem [#allocation2], %s2374_s28 }
  0xa0   : > { %s533_s6 = sshll.u32 %s526_s23, 4  ;;  %p3785_p9 = pnand %p2881_p5, %p3754_p13  ;;  %s3781_s6 = int_to_ptr.vmem [resolvable:$true] %s533_s6 }
  0xa1   : > { %s3792_s3 = scalar_lea.hbm %s4027_s1, %s2497_s21  ;;  %s547_s4 = scalar_lea.vmem [#allocation5], %s2374_s28 }
  0xa2   : > { %s3794_s10 = sshll.u32 %s547_s4, 4  ;;  %s3796_s11 = scalar_lea.sflag [#allocation3], %s522_s24  ;;  %s3827_s10 = int_to_ptr.vmem [resolvable:$true] %s3794_s10 }
  0xa3   : > { %s3333_s23 = scalar_lea.hbm %s3779_s5, 256  ;;  %p3335_p12 = pneg %p3785_p9 }
  0xa4   : > { %p3334_p7 = scmp.ne.s32.totalorder %s3779_s5, %s3333_s23  ;;  %s3338_s8 = scalar_lea.hbm %s4026_s0, 512 }
  0xa5   : > { %p3339_p13 = scmp.lt.s32.totalorder %s3779_s5, %s4026_s0  ;;  %p3340_p2 = scmp.lt.s32.totalorder %s3338_s8, %s3333_s23 }
  0xa6   : > { %p3336_p11 = pnand %p3335_p12, %p3334_p7 }
  0xa7   : > { %p3341_p0 = por %p3340_p2, %p3339_p13 }
  0xa8   : > { %p3337_p4 = pneg %p3336_p11 }
  0xaa   : > { %p3342_p5 = pnand %p3341_p0, %p3337_p4 }
  0xac   : > { %3345 = shalt.err (!%p3342_p5)
}
  0xad   : > { %s3346_s24 = scalar_lea.vmem %s3781_s6, 256  ;;  %s3497_s2 = smov [#allocation2]  }
  0xae   : > { %p3347_p1 = scmp.ne.s32.totalorder %s3781_s6, %s3346_s24  ;;  %s3351_s28 = sshll.u32 %s3497_s2, 4  ;;  %s3352_s28 = int_to_ptr.vmem [resolvable:$false] %s3351_s28 }
  0xaf   : > { %s3353_s4 = scalar_lea.vmem %s3352_s28, 512  ;;  %p3354_p10 = scmp.lt.s32.totalorder %s3781_s6, %s3352_s28 }
  0xb0   : > { %p3349_p7 = pnand %p3347_p1, %p3335_p12  ;;  %p3355_p8 = scmp.lt.s32.totalorder %s3353_s4, %s3346_s24 }
  0xb2   : > { %p3350_p11 = pneg %p3349_p7  ;;  %p3356_p6 = por %p3355_p8, %p3354_p10 }
  0xb4   : > { %p3357_p13 = pnand %p3356_p6, %p3350_p11 }
  0xb6   : > { %3360 = shalt.err (!%p3357_p13)
}
  0xb7   : > { %2863 = dma.hbm_to_vmem [thread:$0]  (!%p3785_p9), %s3779_s5, 256, %s3781_s6, %s3796_s11, %s4070_s27, %s4070_s27, %s4069_s25  }
  0xb8   : > { %s543_s23 = sand.u32 1, %s3481_s16   ;;  %s3361_s8 = scalar_lea.hbm %s3792_s3, 256 }
  0xb9   : > { %s544_s22 = scalar_lea.sflag [#allocation6], %s543_s23  ;;  %p3362_p1 = scmp.ne.s32.totalorder %s3792_s3, %s3361_s8 }
  0xba   : > { %s3366_s24 = scalar_lea.hbm %s4027_s1, 512  ;;  %p3367_p10 = scmp.lt.s32.totalorder %s3792_s3, %s4027_s1 }
  0xbb   : > { %p3364_p6 = pnand %p3362_p1, %p3335_p12  ;;  %p3368_p4 = scmp.lt.s32.totalorder %s3366_s24, %s3361_s8 }
  0xbd   : > { %p3365_p8 = pneg %p3364_p6  ;;  %p3369_p2 = por %p3368_p4, %p3367_p10 }
  0xbf   : > { %p3370_p0 = pnand %p3369_p2, %p3365_p8 }
  0xc1   : > { %3373 = shalt.err (!%p3370_p0)
}
  0xc2   : > { %s3374_s5 = scalar_lea.vmem %s3827_s10, 256  ;;  %s3498_s6 = smov [#allocation5]  }
  0xc3   : > { %p3375_p5 = scmp.ne.s32.totalorder %s3827_s10, %s3374_s5  ;;  %s3379_s11 = sshll.u32 %s3498_s6, 4  ;;  %s3380_s11 = int_to_ptr.vmem [resolvable:$false] %s3379_s11 }
  0xc4   : > { %s3381_s25 = scalar_lea.vmem %s3380_s11, 512  ;;  %p3382_p13 = scmp.lt.s32.totalorder %s3827_s10, %s3380_s11 }
  0xc5   : > { %p3377_p7 = pnand %p3375_p5, %p3335_p12  ;;  %p3383_p1 = scmp.lt.s32.totalorder %s3381_s25, %s3374_s5 }
  0xc7   : > { %p3378_p11 = pneg %p3377_p7  ;;  %p3384_p6 = por %p3383_p1, %p3382_p13 }
  0xc9   : > { %p3385_p10 = pnand %p3384_p6, %p3378_p11 }
  0xcb   : > { %3388 = shalt.err (!%p3385_p10)
}
  0xcc   : > { %s4083_s27 = smov 8   ;;  %s4084_s4 = smov 128  }
  0xcd   : > { %2866 = dma.hbm_to_vmem [thread:$0]  (!%p3785_p9), %s3792_s3, 256, %s3827_s10, %s544_s22, %s4084_s4, %s4084_s4, %s4083_s27  }
  0xce   : > { %566 = sbr.rel (%p3606_p3) target bundleno = 2923 (0xb6b), region = 76  ;;  %s3858_s23 = sand.u32 (!%p3606_p3), 1, %s3473_s30  }
  0xcf   : > { %s3861_s8 = sshll.u32 (!%p3606_p3), %s3858_s23, 4  ;;  %s569_s9 = scalar_lea.sflag (!%p3606_p3), [#allocation3], %s3858_s23 }
  0xd0   : > { %s572_s7 = scalar_lea.vmem (!%p3606_p3), [#allocation2], %s3861_s8  ;;  %p4085_p12 = scmp.ne.s32.totalorder (!%p3606_p3), %s4079_s18, 0 }
  0xd3   : > { %3432 = dma.done.wait (%p4085_p12), %s569_s9, 256  }
  0xd4   : > { %3434 = vsyncadd (%p4085_p12), %s569_s9, 4294967040  ;;  %s577_s10 = sand.u32 1, %s3601_s19   ;;  %s581_s3 = scalar_lea.vmem [#allocation5], %s3861_s8 }
  0xd5   : > { %s578_s20 = scalar_lea.sflag [#allocation6], %s577_s10 }
  0xd6   : > { %3436 = dma.done.wait (%p4085_p12), %s578_s20, 256  }
  0xd7   : > { %3438 = vsyncadd (%p4085_p12), %s578_s20, 4294967040  ;;  %p4086_p3 = scmp.eq.s32.totalorder %s3601_s19, 0 }
  0xd9   : > { %3440 = dma.done.wait (%p4086_p3), [#allocation6], 128   ;;  %p4087_p9 = pmov %p4086_p3 }
  0xda   : > { %p4088_p8 = pmov %p4086_p3 }
  0xdb   : > { %3442 = vsyncadd (%p4087_p9), [#allocation6], 4294967168 }
  0xdc   : > { %3444 = dma.done.wait (%p4088_p8), [#allocation9], 2048   ;;  %p4089_p4 = pmov %p4086_p3 }
  0xdd   : > { %p4090_p2 = pmov %p4086_p3 }
  0xde   : > { %3446 = vsyncadd (%p4089_p4), [#allocation9], 4294965248 }
  0xdf   : > { %3448 = dma.done.wait (%p4090_p2), [#allocation12], 2048   ;;  %p4091_p0 = pmov %p4090_p2 }
  0xe1   : > { %3450 = vsyncadd (%p4091_p0), [#allocation12], 4294965248  ;;  %p4092_p5 = pmov %p4091_p0 }
  0xe2   : > { %p4093_p7 = pmov %p4091_p0 }
  0xe3   : > { %3452 = dma.done.wait (%p4092_p5), [#allocation15], 4096  }
  0xe4   : > { %3454 = vsyncadd (%p4093_p7), [#allocation15], 4294963200  ;;  %p4094_p11 = pmov %p4091_p0 }
  0xe5   : > { %p4095_p13 = pmov %p4091_p0 }
  0xe6   : > { %3456 = dma.done.wait (%p4094_p11), [#allocation18], 2048  }
  0xe7   : > { %3458 = vsyncadd (%p4095_p13), [#allocation18], 4294965248  ;;  %p4096_p1 = pmov %p4091_p0 }
  0xe8   : > { %p4097_p6 = pmov %p4091_p0 }
  0xe9   : > { %3460 = dma.done.wait (%p4096_p1), [#allocation21], 1024  }
  0xea   : > { %3462 = vsyncadd (%p4097_p6), [#allocation21], 4294966272  ;;  %v2944_v0 = vld [vmem:[#allocation10 + $0x38] sm:$0xff]   ;;  %v2945_v1 = vld [vmem:[#allocation10 + $0x30] sm:$0xff]   ;;  %vm1093_vm0 = vcmask 261120   ;;  %vm3501_vm1 = vmmov 0  }
  0xeb   : > { %2631 = vmatprep.subr.bf16.mxu1 %v2944_v0  ;;  %v2946_v2 = vld [vmem:[#allocation8 + $0x38] sm:$0xff]   ;;  %v2947_v3 = vld [vmem:[#allocation10 + $0x28] sm:$0xff]   ;;  %v2948_v4 = vld [vmem:[#allocation8 + $0x30] sm:$0xff]   ;;  %s670_s2 = scalar_lea.vmem [#allocation22], %s3861_s8  ;;  %s2499_s5 = sshll.u32 %s3601_s19, 8 }
  0xec   : > { %2632 = vmatpush3.bf16.msra.mxu1 %v2944_v0  ;;  %2611 = vmatprep.subr.bf16.mxu0 %v2946_v2  ;;  %v2950_v5 = vld [vmem:[#allocation8 + $0x28] sm:$0xff]   ;;  %v2949_v6 = vld [vmem:[#allocation10 + $0x20] sm:$0xff]   ;;  %v2951_v8 = vld [vmem:[#allocation10 + $0x18] sm:$0xff]   ;;  %s2170_s28 = sshll.u32 %s670_s2, 4  ;;  %s4098_s25 = sld [smem:[#allocation43_spill]]  ;;  %s3978_s28 = int_to_ptr.vmem [resolvable:$true] %s2170_s28 }
  0xed   : > { %2633 = vmatprep.subr.bf16.mxu1 %v2945_v1  ;;  %2612 = vmatpush3.bf16.msra.mxu0 %v2946_v2  ;;  %v2952_v7 = vld [vmem:[#allocation8 + $0x20] sm:$0xff]   ;;  %v2954_v9 = vld [vmem:[#allocation8 + $0x18] sm:$0xff]   ;;  %v2953_v10 = vld [vmem:[#allocation10 + $0x10] sm:$0xff]   ;;  %s2157_s4 = scalar_lea.sflag [#allocation4], %s3858_s23  ;;  %s3389_s8 = scalar_lea.vmem %s3978_s28, 256 }
  0xee   : > { %2613 = vmatprep.subr.bf16.mxu0 %v2948_v4  ;;  %v3901_v11 = vld [vmem:[%s572_s7] sm:$0xff]   ;;  %v2956_v12 = vld [vmem:[#allocation8 + $0x10] sm:$0xff]   ;;  %v2957_v15 = vld [vmem:[#allocation10] sm:$0xff]   ;;  %p3390_p10 = scmp.ne.s32.totalorder %s3978_s28, %s3389_s8  ;;  %p4099_p12 = scmp.ne.s32.totalorder %s4080_s14, 0 }
  0xef   : > { %v2955_v13 = vld [vmem:[#allocation10 + $0x8] sm:$0xff]   ;;  %2647 = vmatprep.mubr.bf16.mxu1 %v3901_v11  ;;  %2627 = vmatprep.mubr.bf16.mxu0 %v3901_v11  ;;  %v2961_v16 = vld [vmem:[#allocation8] sm:$0xff]   ;;  %v2962_v30 = vld [vmem:[#allocation11 + $0x38] sm:$0xff]   ;;  %s3502_s19 = smov [#allocation22]  }
  0xf0   : > { %2634 = vmatpush3.bf16.msra.mxu1 %v2945_v1  ;;  %v2958_v14 = vld [vmem:[#allocation8 + $0x8] sm:$0xff]   ;;  %v3907_v17 = vld [vmem:[%s572_s7 + $0x8] sm:$0xff]   ;;  %v2966_v34 = vld [vmem:[#allocation11 + $0x18] sm:$0xff]   ;;  %p3391_p3 = pnand %p3390_p10, %p4099_p12  ;;  %s3393_s9 = sshll.u32 %s3502_s19, 4  ;;  %s3394_s9 = int_to_ptr.vmem [resolvable:$false] %s3393_s9 }
  0xf1   : > { %2635 = vmatprep.subr.bf16.mxu1 %v2947_v3  ;;  %2614 = vmatpush3.bf16.msra.mxu0 %v2948_v4  ;;  %v2963_v31 = vld [vmem:[#allocation11 + $0x30] sm:$0xff]   ;;  %v2964_v32 = vld [vmem:[#allocation11 + $0x28] sm:$0xff]   ;;  %v2965_v33 = vld [vmem:[#allocation11 + $0x20] sm:$0xff]   ;;  %s3395_s7 = scalar_lea.vmem %s3394_s9, 512  ;;  %p3396_p8 = scmp.lt.s32.totalorder %s3978_s28, %s3394_s9 }
  0xf2   : > { %2615 = vmatprep.subr.bf16.mxu0 %v2950_v5  ;;  %v2967_v35 = vld [vmem:[#allocation11 + $0x10] sm:$0xff]   ;;  %v2968_v36 = vld [vmem:[#allocation11 + $0x8] sm:$0xff]   ;;  %v2969_v37 = vld [vmem:[#allocation11] sm:$0xff]   ;;  %s3983_s27 = scalar_lea.hbm %s4098_s25, %s2499_s5  ;;  %p3392_p9 = pneg %p3391_p3 }
  0xf3   : > { %p3397_p4 = scmp.lt.s32.totalorder %s3395_s7, %s3389_s8 }
  0xf4   : > { %2636 = vmatpush3.bf16.msra.mxu1 %v2947_v3 }
  0xf5   : > { %2637 = vmatprep.subr.bf16.mxu1 %v2949_v6  ;;  %2616 = vmatpush3.bf16.msra.mxu0 %v2950_v5  ;;  %p3398_p2 = por %p3397_p4, %p3396_p8 }
  0xf6   : > { %2617 = vmatprep.subr.bf16.mxu0 %v2952_v7 }
  0xf7   : > { %p3399_p0 = pnand %p3398_p2, %p3392_p9 }
  0xf8   : > { %2638 = vmatpush3.bf16.msra.mxu1 %v2949_v6 }
  0xf9   : > { %2639 = vmatprep.subr.bf16.mxu1 %v2951_v8  ;;  %2618 = vmatpush3.bf16.msra.mxu0 %v2952_v7 }
  0xfa   : > { %2619 = vmatprep.subr.bf16.mxu0 %v2954_v9 }
  0xfc   : > { %2640 = vmatpush3.bf16.msra.mxu1 %v2951_v8 }
  0xfd   : > { %2641 = vmatprep.subr.bf16.mxu1 %v2953_v10  ;;  %2620 = vmatpush3.bf16.msra.mxu0 %v2954_v9 }
  0xfe   : > { %2621 = vmatprep.subr.bf16.mxu0 %v2956_v12 }
 0x100   : > { %2642 = vmatpush3.bf16.msra.mxu1 %v2953_v10 }
 0x101   : > { %2643 = vmatprep.subr.bf16.mxu1 %v2955_v13  ;;  %2622 = vmatpush3.bf16.msra.mxu0 %v2956_v12 }
 0x102   : > { %2623 = vmatprep.subr.bf16.mxu0 %v2958_v14 }
 0x104   : > { %2644 = vmatpush3.bf16.msra.mxu1 %v2955_v13  ;;  %v2970_v13 = vld [vmem:[#allocation13 + $0x38] sm:$0xff]  }
 0x105   : > { %2645 = vmatprep.subr.bf16.mxu1 %v2957_v15  ;;  %2624 = vmatpush3.bf16.msra.mxu0 %v2958_v14 }
 0x106   : > { %2625 = vmatprep.subr.bf16.mxu0 %v2961_v16 }
 0x108   : > { %2646 = vmatpush3.bf16.msra.mxu1 %v2957_v15 }
 0x109   : > { %2626 = vmatpush3.bf16.msra.mxu0 %v2961_v16 }
 0x10a   : > { %2651 = vmatprep.subr.bf16.mxu0 %v2962_v30 }
 0x10b   : > { %2648 = vmatmul.mubr.bf16.vlgmr.msra.gmra.mxu1 %v3907_v17 }
 0x10c   : > { %2628 = vmatmul.mubr.bf16.vlgmr.msra.gmra.mxu0 %v3907_v17 }
 0x10d   : > { %2667 = vmatprep.mubr.bf16.mxu0 %v3901_v11  ;;  %2652 = vmatpush3.bf16.msra.mxu0 %v2962_v30  ;;  %v2972_v30 = vld [vmem:[#allocation13 + $0x28] sm:$0xff]  }
 0x10e   : > { %2653 = vmatprep.subr.bf16.mxu0 %v2963_v31 }
 0x111   : > { %2654 = vmatpush3.bf16.msra.mxu0 %v2963_v31  ;;  %v2973_v31 = vld [vmem:[#allocation13 + $0x20] sm:$0xff]  }
 0x112   : > { %2655 = vmatprep.subr.bf16.mxu0 %v2964_v32 }
 0x115   : > { %2656 = vmatpush3.bf16.msra.mxu0 %v2964_v32  ;;  %v2974_v32 = vld [vmem:[#allocation13 + $0x18] sm:$0xff]  }
 0x116   : > { %2657 = vmatprep.subr.bf16.mxu0 %v2965_v33 }
 0x119   : > { %2658 = vmatpush3.bf16.msra.mxu0 %v2965_v33  ;;  %v2975_v33 = vld [vmem:[#allocation13 + $0x10] sm:$0xff]  }
 0x11a   : > { %2659 = vmatprep.subr.bf16.mxu0 %v2966_v34 }
 0x11d   : > { %2660 = vmatpush3.bf16.msra.mxu0 %v2966_v34  ;;  %v2976_v34 = vld [vmem:[#allocation13 + $0x8] sm:$0xff]  }
 0x11e   : > { %2661 = vmatprep.subr.bf16.mxu0 %v2967_v35 }
 0x121   : > { %2662 = vmatpush3.bf16.msra.mxu0 %v2967_v35  ;;  %v2977_v35 = vld [vmem:[#allocation13] sm:$0xff]  }
 0x122   : > { %2663 = vmatprep.subr.bf16.mxu0 %v2968_v36 }
 0x125   : > { %2664 = vmatpush3.bf16.msra.mxu0 %v2968_v36  ;;  %v2978_v36 = vld [vmem:[#allocation14 + $0x70] ss:$8 sps:$4 sm:$0xff]  }
 0x126   : > { %2665 = vmatprep.subr.bf16.mxu0 %v2969_v37 }
 0x129   : > { %2666 = vmatpush3.bf16.msra.mxu0 %v2969_v37  ;;  %v2980_v37 = vld [vmem:[#allocation14 + $0x74] ss:$8 sps:$4 sm:$0xff]  }
 0x12a   : > { %1412 = vmatprep.subr.bf16.mxu0 %v2980_v37  ;;  %v3030_v37 = vld [vmem:[#allocation20 + $0x30] sm:$0xff]  }
 0x12c   : > { %2668 = vmatmul.mubr.bf16.vlgmr.msra.gmra.mxu0 %v3907_v17 }
 0x12d   : > { %1413 = vmatpush1.bf16.msra.mxu0 %v2978_v36  ;;  %v3028_v36 = vld [vmem:[#allocation7] sm:$0xff]  }
 0x1cb   : > { %v2649_v18 = vpop.f32.mrf.mxu1 }
 0x1cc   : > { %v2629_v20 = vpop.f32.mrf.mxu0 }
 0x1cd   : > { %v906_v19 = vpop.f32.mrf.mxu1 }
 0x1ce   : > { %v793_v22 = vpop.f32.mrf.mxu0 }
 0x1cf   : > { %v2650_v21 = vpop.f32.mrf.mxu1 }
 0x1d0   : > { %v1037_v23 = vpack.c.bf16 %v2650_v21, %v2649_v18  ;;  %v2630_v25 = vpop.f32.mrf.mxu0 }
 0x1d1   : > { %v909_v24 = vpop.f32.mrf.mxu1  ;;  %v1035_v29 = vpack.c.bf16 %v2630_v25, %v2629_v20 }
 0x1d2   : > { %v1036_v26 = vpack.c.bf16 %v909_v24, %v906_v19  ;;  %2671 = vmatprep.subr.bf16.mxu1 %v1037_v23  ;;  %v796_v27 = vpop.f32.mrf.mxu0 }
 0x1d3   : > { %2672 = vmatpush3.bf16.xpose.msra.mxu1 %v1037_v23  ;;  %v1034_v28 = vpack.c.bf16 %v796_v27, %v793_v22 }
 0x1d4   : > { %2673 = vmatprep.subr.bf16.mxu1 %v1036_v26 }
 0x1d5   : > { %2675 = vmatprep.mubr.bf16.mxu1 %v1034_v28 }
 0x1db   : > { %2674 = vmatpush3.bf16.xpose.msra.mxu1 %v1036_v26 }
 0x1e2   : > { %2676 = vmatmul.mubr.bf16.vlgmr.msra.gmra.mxu1 %v1035_v29  ;;  %v2971_v29 = vld [vmem:[#allocation13 + $0x30] sm:$0xff]  }
 0x1ec   : > { %v2669_v6 = vpop.f32.mrf.mxu0 }
 0x1ee   : > { %v1019_v7 = vpop.f32.mrf.mxu0 }
 0x1f0   : > { %v2670_v8 = vpop.f32.mrf.mxu0 }
 0x1f1   : > { %v1039_v9 = vpack.c.bf16 %v2670_v8, %v2669_v6  ;;  %v680_v8 = vunpack.c.h.bf16 %v3901_v11 }
 0x1f2   : > { %v1022_v10 = vpop.f32.mrf.mxu0 }
 0x1f3   : > { %2679 = vmatprep.subr.bf16.mxu1 %v1039_v9  ;;  %v1038_v12 = vpack.c.bf16 %v1022_v10, %v1019_v7  ;;  %v679_v7 = vunpack.c.l.bf16 %v3901_v11 }
 0x1f4   : > { %2680 = vmatpush3.bf16.msra.mxu1 %v1039_v9 }
 0x1f5   : > { %2681 = vmatprep.subr.bf16.mxu1 %v1038_v12 }
 0x1f8   : > { %2682 = vmatpush3.bf16.msra.mxu1 %v1038_v12 }
 0x1f9   : > { %2687 = vmatprep.subr.bf16.mxu1 %v2970_v13 }
 0x2a2   : > { %v2677_v38 = vpop.f32.mrf.mxu1 }
 0x2a3   : > { %v1091_v39 = vmul.f32 0.088388346, %v2677_v38  ;;  %v2983_v38 = vld [vmem:[#allocation14 + $0x64] ss:$8 sps:$4 sm:$0xff]  }
 0x2a4   : > { %v1074_v40 = vpop.f32.mrf.mxu1  ;;  %1414 = vmatprep.subr.bf16.mxu0 %v2983_v38  ;;  %v3032_v38 = vld [vmem:[#allocation20 + $0x28] sm:$0xff]  }
 0x2a5   : > { %v1089_v41 = vmul.f32 0.088388346, %v1074_v40  ;;  %v1100_v42 = vsel %vm1093_vm0, %v1091_v39, -inf  ;;  %v2986_v40 = vld [vmem:[#allocation14 + $0x54] ss:$8 sps:$4 sm:$0xff]  }
 0x2a6   : > { %1101 = vmax.xlane.f32.xlu1 %v1100_v42  ;;  %v2678_v43 = vpop.f32.mrf.mxu1  ;;  %v2989_v42 = vld [vmem:[#allocation14 + $0x44] ss:$8 sps:$4 sm:$0xff]  }
 0x2a7   : > { %v1092_v44 = vmul.f32 0.088388346, %v2678_v43  ;;  %v1094_v45 = vsel %vm1093_vm0, %v1089_v41, -inf  ;;  %v2987_v43 = vld [vmem:[#allocation14 + $0x40] ss:$8 sps:$4 sm:$0xff]  }
 0x2a8   : > { %1095 = vmax.xlane.f32.xlu0 %v1094_v45  ;;  %v1077_v46 = vpop.f32.mrf.mxu1  ;;  %v2990_v45 = vld [vmem:[#allocation14 + $0x30] ss:$8 sps:$4 sm:$0xff]  }
 0x2a9   : > { %v1090_v47 = vmul.f32 0.088388346, %v1077_v46  ;;  %v1103_v48 = vsel %vm1093_vm0, %v1092_v44, -inf  ;;  %v2995_v46 = vld [vmem:[#allocation14 + $0x24] ss:$8 sps:$4 sm:$0xff]  }
 0x2aa   : > { %1104 = vmax.xlane.f32.xlu1 %v1103_v48 }
 0x2ab   : > { %v1097_v49 = vsel %vm1093_vm0, %v1090_v47, -inf }
 0x2ac   : > { %1098 = vmax.xlane.f32.xlu0 %v1097_v49 }
 0x32f   : > { %v1102_v50 = vpop.xlane.xlu1 %1101 }
 0x330   : > { %v1108_v51 = vsub.f32 %v1091_v39, %v1102_v50  ;;  %v2981_v39 = vld [vmem:[#allocation14 + $0x60] ss:$8 sps:$4 sm:$0xff]  }
 0x331   : > { %v1096_v52 = vpop.xlane.xlu0 %1095  ;;  %1415 = vmatpush1.bf16.msra.mxu0 %v2981_v39 }
 0x332   : > { %v1106_v53 = vsub.f32 %v1089_v41, %v1096_v52  ;;  %v1114_v55 = vmul.f32 1.442695, %v1108_v51  ;;  %v2984_v41 = vld [vmem:[#allocation14 + $0x50] ss:$8 sps:$4 sm:$0xff]   ;;  %1416 = vmatprep.subr.bf16.mxu0 %v2986_v40 }
 0x333   : > { %v1105_v54 = vpop.xlane.xlu1 %1104 }
 0x334   : > { %v1110_v56 = vmul.f32 1.442695, %v1106_v53  ;;  %v1109_v57 = vsub.f32 %v1092_v44, %v1105_v54  ;;  %v2992_v44 = vld [vmem:[#allocation14 + $0x34] ss:$8 sps:$4 sm:$0xff]  }
 0x335   : > { %v1099_v58 = vpop.xlane.xlu0 %1098  ;;  %1417 = vmatpush1.bf16.msra.mxu0 %v2984_v41  ;;  %v2998_v54 = vld [vmem:[#allocation14 + $0x14] ss:$8 sps:$4 sm:$0xff]  }
 0x336   : > { %3045 = vpow2.f32 %v1110_v56  ;;  %v1107_v59 = vsub.f32 %v1090_v47, %v1099_v58  ;;  %v1116_v60 = vmul.f32 1.442695, %v1109_v57  ;;  %1418 = vmatprep.subr.bf16.mxu0 %v2989_v42  ;;  %v2993_v47 = vld [vmem:[#allocation14 + $0x20] ss:$8 sps:$4 sm:$0xff]   ;;  %v3001_v56 = vld [vmem:[#allocation14 + $0x4] ss:$8 sps:$4 sm:$0xff]  }
 0x337   : > { %3047 = vpow2.f32 %v1114_v55  ;;  %v2996_v55 = vld [vmem:[#allocation14 + $0x10] ss:$8 sps:$4 sm:$0xff]   ;;  %v2999_v57 = vld [vmem:[#allocation14] ss:$8 sps:$4 sm:$0xff]   ;;  %v3499_v58 = vmov 0  }
 0x338   : > { %v1112_v61 = vmul.f32 1.442695, %v1107_v59  ;;  %1444 = vmatprep.mubr.bf16.mxu0 %v3499_v58  ;;  %v3002_v59 = vld [vmem:[#allocation16 + $0x78] sm:$0xff]  }
 0x339   : > { %1419 = vmatpush1.bf16.msra.mxu0 %v2987_v43 }
 0x33a   : > { %3049 = vpow2.f32 %v1112_v61  ;;  %1420 = vmatprep.subr.bf16.mxu0 %v2992_v44  ;;  %v3004_v61 = vld [vmem:[#allocation16 + $0x70] sm:$0xff]  }
 0x33b   : > { %3051 = vpow2.f32 %v1116_v60  ;;  %v3003_v60 = vld [vmem:[#allocation16 + $0x38] sm:$0xff]  }
 0x33d   : > { %1421 = vmatpush1.bf16.msra.mxu0 %v2990_v45 }
 0x33e   : > { %1422 = vmatprep.subr.bf16.mxu0 %v2995_v46 }
 0x341   : > { %1423 = vmatpush1.bf16.msra.mxu0 %v2993_v47 }
 0x342   : > { %1424 = vmatprep.subr.bf16.mxu0 %v2998_v54 }
 0x343   : > { %v3046_v62 = vpop.eup %3045 }
 0x344   : > { %v1118_v63 = vsel %vm1093_vm0, %v3046_v62, 0.0  ;;  %v3048_v0 = vpop.eup %3047 }
 0x345   : > { %1119 = vadd.xlane.f32.xlu0 %v1118_v63  ;;  %v1124_v2 = vsel %vm1093_vm0, %v3048_v0, 0.0  ;;  %1425 = vmatpush1.bf16.msra.mxu0 %v2996_v55  ;;  %v3006_v63 = vld [vmem:[#allocation16 + $0x68] sm:$0xff]  }
 0x346   : > { %1426 = vmatprep.subr.bf16.mxu0 %v3001_v56  ;;  %v3031_v55 = vld [vmem:[#allocation19 + $0x28] sm:$0xff]  }
 0x347   : > { %v3050_v1 = vpop.eup %3049 }
 0x348   : > { %v1121_v3 = vsel %vm1093_vm0, %v3050_v1, 0.0  ;;  %v3052_v4 = vpop.eup %3051 }
 0x349   : > { %1125 = vadd.xlane.f32.xlu0 %v1124_v2  ;;  %1122 = vadd.xlane.f32.xlu1 %v1121_v3  ;;  %v1127_v5 = vsel %vm1093_vm0, %v3052_v4, 0.0  ;;  %v3009_v2 = vld [vmem:[#allocation16 + $0x20] sm:$0xff]   ;;  %v3010_v3 = vld [vmem:[#allocation16 + $0x58] sm:$0xff]  }
 0x34a   : > { %1427 = vmatpush1.bf16.msra.mxu0 %v2999_v57 }
 0x34d   : > { %1128 = vadd.xlane.f32.xlu1 %v1127_v5 }
 0x3ce   : > { %v1120_v14 = vpop.xlane.xlu0 %1119 }
 0x3cf   : > { %3053 = vrcp.f32 %v1120_v14  ;;  %v682_v14 = vunpack.c.h.bf16 %v3907_v17 }
 0x3d2   : > { %v1123_v15 = vpop.xlane.xlu1 %1122  ;;  %v1126_v16 = vpop.xlane.xlu0 %1125 }
 0x3d3   : > { %3055 = vrcp.f32 %v1123_v15 }
 0x3d4   : > { %3057 = vrcp.f32 %v1126_v16  ;;  %v681_v16 = vunpack.c.l.bf16 %v3907_v17  ;;  %v3017_v17 = vld [vmem:[#allocation16] sm:$0xff]  }
 0x3d6   : > { %v1129_v18 = vpop.xlane.xlu1 %1128 }
 0x3d7   : > { %3059 = vrcp.f32 %v1129_v18 }
 0x3dc   : > { %v3054_v19 = vpop.eup %3053 }
 0x3dd   : > { %v1134_v21 = vmul.f32 %v3054_v19, %v3046_v62  ;;  %v3005_v62 = vld [vmem:[#allocation16 + $0x30] sm:$0xff]  }
 0x3e0   : > { %v3056_v20 = vpop.eup %3055 }
 0x3e1   : > { %v1135_v22 = vmul.f32 %v3056_v20, %v3050_v1  ;;  %v3058_v23 = vpop.eup %3057  ;;  %v3008_v1 = vld [vmem:[#allocation16 + $0x60] sm:$0xff]   ;;  %v3012_v20 = vld [vmem:[#allocation16 + $0x50] sm:$0xff]  }
 0x3e2   : > { %v1136_v26 = vmul.f32 %v3058_v23, %v3048_v0  ;;  %v3007_v0 = vld [vmem:[#allocation16 + $0x28] sm:$0xff]  }
 0x3e3   : > { %v1138_v24 = vpack.c.bf16 %v1135_v22, %v1134_v21  ;;  %v3013_v21 = vld [vmem:[#allocation16 + $0x10] sm:$0xff]   ;;  %v3014_v22 = vld [vmem:[#allocation16 + $0x48] sm:$0xff]  }
 0x3e4   : > { %v3060_v25 = vpop.eup %3059  ;;  %v3015_v23 = vld [vmem:[#allocation16 + $0x8] sm:$0xff]  }
 0x3e5   : > { %2683 = vmatprep.mubr.msk.bf16.mxu1 %vm1093_vm0, %v1138_v24  ;;  %v1137_v27 = vmul.f32 %v3060_v25, %v3052_v4  ;;  %v3011_v4 = vld [vmem:[#allocation16 + $0x18] sm:$0xff]   ;;  %v3016_v24 = vld [vmem:[#allocation16 + $0x40] sm:$0xff]  }
 0x3e6   : > { %v3018_v25 = vld [vmem:[#allocation17 + $0x38] sm:$0xff]  }
 0x3e7   : > { %v1139_v28 = vpack.c.bf16 %v1137_v27, %v1136_v26  ;;  %v3500_v26 = vmov 0.0   ;;  %v3019_v27 = vld [vmem:[#allocation17 + $0x30] sm:$0xff]  }
 0x3e8   : > { %2707 = vmatprep.subr.bf16.mxu0 %v3500_v26 }
 0x3e9   : > { %2684 = vmatmul.mubr.msk.bf16.vlgmr.msra.gmra.mxu1 %vm1093_vm0, %v1139_v28  ;;  %v3026_v28 = vld [vmem:[#allocation19 + $0x38] sm:$0xff]  }
 0x3ea   : > { %2688 = vmatpush3.bf16.msra.mxu1 %v2970_v13 }
 0x3eb   : > { %2689 = vmatprep.subr.bf16.mxu1 %v2971_v29 }
 0x3ee   : > { %2690 = vmatpush3.bf16.msra.mxu1 %v2971_v29  ;;  %v3020_v29 = vld [vmem:[#allocation17 + $0x28] sm:$0xff]  }
 0x3ef   : > { %2691 = vmatprep.subr.bf16.mxu1 %v2972_v30 }
 0x3f2   : > { %2692 = vmatpush3.bf16.msra.mxu1 %v2972_v30  ;;  %v3021_v30 = vld [vmem:[#allocation17 + $0x20] sm:$0xff]  }
 0x3f3   : > { %2693 = vmatprep.subr.bf16.mxu1 %v2973_v31 }
 0x3f6   : > { %2694 = vmatpush3.bf16.msra.mxu1 %v2973_v31  ;;  %v3022_v31 = vld [vmem:[#allocation17 + $0x18] sm:$0xff]  }
 0x3f7   : > { %2695 = vmatprep.subr.bf16.mxu1 %v2974_v32 }
 0x3fa   : > { %2696 = vmatpush3.bf16.msra.mxu1 %v2974_v32  ;;  %v3023_v32 = vld [vmem:[#allocation17 + $0x10] sm:$0xff]  }
 0x3fb   : > { %2697 = vmatprep.subr.bf16.mxu1 %v2975_v33 }
 0x3fe   : > { %2698 = vmatpush3.bf16.msra.mxu1 %v2975_v33  ;;  %v3024_v33 = vld [vmem:[#allocation17 + $0x8] sm:$0xff]  }
 0x3ff   : > { %2699 = vmatprep.subr.bf16.mxu1 %v2976_v34 }
 0x402   : > { %2700 = vmatpush3.bf16.msra.mxu1 %v2976_v34  ;;  %v3025_v34 = vld [vmem:[#allocation17] sm:$0xff]  }
 0x403   : > { %2701 = vmatprep.subr.bf16.mxu1 %v2977_v35 }
 0x406   : > { %2702 = vmatpush3.bf16.msra.mxu1 %v2977_v35  ;;  %v3027_v35 = vld [vmem:[#allocation20 + $0x38] sm:$0xff]  }
 0x407   : > { %2548 = vmatprep.subr.bf16.mxu1 %v3002_v59 }
 0x4a9   : > { %v2685_v48 = vpop.f32.mrf.mxu1 }
 0x4ab   : > { %v1180_v49 = vpop.f32.mrf.mxu1 }
 0x4ad   : > { %v2686_v50 = vpop.f32.mrf.mxu1 }
 0x4ae   : > { %v1196_v53 = vpack.c.bf16 %v2686_v50, %v2685_v48 }
 0x4af   : > { %v1183_v51 = vpop.f32.mrf.mxu1 }
 0x4b0   : > { %v1195_v52 = vpack.c.bf16 %v1183_v51, %v1180_v49  ;;  %v3029_v51 = vld [vmem:[#allocation19 + $0x30] sm:$0xff]  }
 0x4b2   : > { %2703 = vmatprep.mubr.bf16.mxu1 %v1195_v52 }
 0x4b3   : > { %2704 = vmatmul.mubr.bf16.vlgmr.msra.gmra.mxu1 %v1196_v53 }
 0x4b4   : > { %2549 = vmatpush3.bf16.msra.mxu1 %v3003_v60 }
 0x4b5   : > { %2550 = vmatprep.subr.bf16.mxu1 %v3004_v61  ;;  %v3033_v61 = vld [vmem:[#allocation19 + $0x20] sm:$0xff]  }
 0x4b8   : > { %2551 = vmatpush3.bf16.msra.mxu1 %v3005_v62  ;;  %v3034_v62 = vld [vmem:[#allocation20 + $0x20] sm:$0xff]  }
 0x4b9   : > { %2552 = vmatprep.subr.bf16.mxu1 %v3006_v63  ;;  %v3035_v63 = vld [vmem:[#allocation19 + $0x18] sm:$0xff]  }
 0x4bc   : > { %2553 = vmatpush3.bf16.msra.mxu1 %v3007_v0  ;;  %v3036_v0 = vld [vmem:[#allocation20 + $0x18] sm:$0xff]  }
 0x4bd   : > { %2554 = vmatprep.subr.bf16.mxu1 %v3008_v1  ;;  %v3037_v1 = vld [vmem:[#allocation19 + $0x10] sm:$0xff]  }
 0x4c0   : > { %2555 = vmatpush3.bf16.msra.mxu1 %v3009_v2  ;;  %v3038_v2 = vld [vmem:[#allocation20 + $0x10] sm:$0xff]  }
 0x4c1   : > { %2556 = vmatprep.subr.bf16.mxu1 %v3010_v3  ;;  %v3039_v3 = vld [vmem:[#allocation19 + $0x8] sm:$0xff]  }
 0x4c4   : > { %2557 = vmatpush3.bf16.msra.mxu1 %v3011_v4  ;;  %v3040_v4 = vld [vmem:[#allocation20 + $0x8] sm:$0xff]  }
 0x4c5   : > { %2558 = vmatprep.subr.bf16.mxu1 %v3012_v20 }
 0x4c8   : > { %2559 = vmatpush3.bf16.msra.mxu1 %v3013_v21 }
 0x4c9   : > { %2560 = vmatprep.subr.bf16.mxu1 %v3014_v22 }
 0x4cc   : > { %2561 = vmatpush3.bf16.msra.mxu1 %v3015_v23 }
 0x4cd   : > { %2562 = vmatprep.subr.bf16.mxu1 %v3016_v24 }
 0x4d0   : > { %2563 = vmatpush3.bf16.msra.mxu1 %v3017_v17 }
 0x4d1   : > { %2727 = vmatprep.subr.bf16.mxu1 %v3026_v28 }
 0x573   : > { %v2705_v5 = vpop.f32.mrf.mxu1 }
 0x574   : > { %v3935_v19 = vadd.f32 %v2705_v5, %v681_v16  ;;  %v3041_v5 = vld [vmem:[#allocation19] sm:$0xff]  }
 0x575   : > { %v1295_v6 = vpop.f32.mrf.mxu1 }
 0x576   : > { %v3925_v12 = vadd.f32 %v1295_v6, %v679_v7  ;;  %v3042_v6 = vld [vmem:[#allocation20] sm:$0xff]  }
 0x577   : > { %v2706_v9 = vpop.f32.mrf.mxu1 }
 0x578   : > { %v3933_v18 = vadd.f32 %v2706_v9, %v682_v14 }
 0x579   : > { %v1298_v10 = vpop.f32.mrf.mxu1 }
 0x57a   : > { %v3927_v13 = vadd.f32 %v1298_v10, %v680_v8  ;;  %v1315_v11 = vpack.c.bf16 %v3933_v18, %v3935_v19 }
 0x57c   : > { %v1314_v15 = vpack.c.bf16 %v3927_v13, %v3925_v12 }
 0x57e   : > { %1445 = vmatmul.mubr.bf16.vlgmr.msra.gmra.mxu0 %v1314_v15 }
 0x57f   : > { %1454 = vmatprep.mubr.bf16.mxu0 %v3499_v58  ;;  %2708 = vmatpush3.bf16.msra.mxu0 %v3018_v25 }
 0x580   : > { %2709 = vmatprep.subr.bf16.mxu0 %v3500_v26 }
 0x583   : > { %2710 = vmatpush3.bf16.msra.mxu0 %v3019_v27 }
 0x584   : > { %2711 = vmatprep.subr.bf16.mxu0 %v3500_v26 }
 0x586   : > { %1455 = vmatmul.mubr.bf16.gmra.mxu0 %v1315_v11 }
 0x587   : > { %2723 = vmatprep.mubr.msk.bf16.mxu0 %vm3501_vm1, %v3500_v26  ;;  %2712 = vmatpush3.bf16.msra.mxu0 %v3020_v29 }
 0x588   : > { %2713 = vmatprep.subr.bf16.mxu0 %v3500_v26 }
 0x58b   : > { %2714 = vmatpush3.bf16.msra.mxu0 %v3021_v30 }
 0x58c   : > { %2715 = vmatprep.subr.bf16.mxu0 %v3500_v26 }
 0x58f   : > { %2716 = vmatpush3.bf16.msra.mxu0 %v3022_v31 }
 0x590   : > { %2717 = vmatprep.subr.bf16.mxu0 %v3500_v26 }
 0x593   : > { %2718 = vmatpush3.bf16.msra.mxu0 %v3023_v32 }
 0x594   : > { %2719 = vmatprep.subr.bf16.mxu0 %v3500_v26 }
 0x597   : > { %2720 = vmatpush3.bf16.msra.mxu0 %v3024_v33 }
 0x598   : > { %2721 = vmatprep.subr.bf16.mxu0 %v3500_v26 }
 0x59b   : > { %2722 = vmatpush3.bf16.msra.mxu0 %v3025_v34 }
 0x59c   : > { %2747 = vmatprep.subr.bf16.mxu0 %v3027_v35 }
 0x59e   : > { %2724 = vmatmul.mubr.bf16.vlgmr.msra.gmra.mxu0 %v3028_v36 }
 0x59f   : > { %2748 = vmatpush3.bf16.msra.mxu0 %v3027_v35 }
 0x5a0   : > { %2749 = vmatprep.subr.bf16.mxu0 %v3030_v37 }
 0x5a3   : > { %2750 = vmatpush3.bf16.msra.mxu0 %v3030_v37 }
 0x5a4   : > { %2751 = vmatprep.subr.bf16.mxu0 %v3032_v38 }
 0x5a7   : > { %2752 = vmatpush3.bf16.msra.mxu0 %v3032_v38 }
 0x5a8   : > { %2753 = vmatprep.subr.bf16.mxu0 %v3034_v62 }
 0x5ab   : > { %2754 = vmatpush3.bf16.msra.mxu0 %v3034_v62 }
 0x5ac   : > { %2755 = vmatprep.subr.bf16.mxu0 %v3036_v0 }
 0x5af   : > { %2756 = vmatpush3.bf16.msra.mxu0 %v3036_v0 }
 0x5b0   : > { %2757 = vmatprep.subr.bf16.mxu0 %v3038_v2 }
 0x5b3   : > { %2758 = vmatpush3.bf16.msra.mxu0 %v3038_v2 }
 0x5b4   : > { %2759 = vmatprep.subr.bf16.mxu0 %v3040_v4 }
 0x5b7   : > { %2760 = vmatpush3.bf16.msra.mxu0 %v3040_v4 }
 0x5b8   : > { %2761 = vmatprep.subr.bf16.mxu0 %v3042_v6 }
 0x5bb   : > { %2762 = vmatpush3.bf16.msra.mxu0 %v3042_v6 }
 0x5bc   : > { %2775 = vmatprep.subr.bf16.mxu0 %v3500_v26 }
 0x63e   : > { %v1446_v39 = vpop.f32.mrf.mxu0 }
 0x63f   : > { %v1465_v46 = vmax.f32 %v1446_v39, 0.0 }
 0x640   : > { %v1448_v40 = vpop.f32.mrf.mxu0 }
 0x641   : > { %v1466_v44 = vmax.f32 %v1448_v40, 0.0 }
 0x642   : > { %v1450_v41 = vpop.f32.mrf.mxu0 }
 0x643   : > { %v1467_v42 = vmax.f32 %v1450_v41, 0.0 }
 0x644   : > { %v1452_v43 = vpop.f32.mrf.mxu0 }
 0x645   : > { %v1468_v45 = vmax.f32 %v1452_v43, 0.0  ;;  %v1473_v49 = vpack.c.bf16 %v1467_v42, %v1465_v46 }
 0x646   : > { %v1456_v47 = vpop.f32.mrf.mxu0 }
 0x647   : > { %v1474_v48 = vpack.c.bf16 %v1468_v45, %v1466_v44  ;;  %v1469_v58 = vmax.f32 %v1456_v47, 0.0 }
 0x648   : > { %v1458_v50 = vpop.f32.mrf.mxu0 }
 0x649   : > { %1637 = vmatprep.mubr.bf16.mxu1 %v1474_v48  ;;  %v1470_v56 = vmax.f32 %v1458_v50, 0.0 }
 0x64a   : > { %v1460_v52 = vpop.f32.mrf.mxu0  ;;  %1638 = vmatmul.mubr.bf16.vlgmr.msra.gmra.mxu1 %v1473_v49 }
 0x64b   : > { %2728 = vmatpush3.bf16.msra.mxu1 %v3026_v28  ;;  %v1471_v53 = vmax.f32 %v1460_v52, 0.0 }
 0x64c   : > { %v1462_v54 = vpop.f32.mrf.mxu0  ;;  %2729 = vmatprep.subr.bf16.mxu1 %v3029_v51 }
 0x64d   : > { %v1472_v57 = vmax.f32 %v1462_v54, 0.0  ;;  %v1475_v60 = vpack.c.bf16 %v1471_v53, %v1469_v58 }
 0x64f   : > { %v1476_v59 = vpack.c.bf16 %v1472_v57, %v1470_v56  ;;  %2730 = vmatpush3.bf16.msra.mxu1 %v3029_v51 }
 0x650   : > { %2731 = vmatprep.subr.bf16.mxu1 %v3031_v55 }
 0x651   : > { %1645 = vmatprep.mubr.bf16.mxu1 %v1476_v59 }
 0x652   : > { %1646 = vmatmul.mubr.bf16.gmra.mxu1 %v1475_v60 }
 0x653   : > { %2732 = vmatpush3.bf16.msra.mxu1 %v3031_v55 }
 0x654   : > { %2733 = vmatprep.subr.bf16.mxu1 %v3033_v61 }
 0x657   : > { %2734 = vmatpush3.bf16.msra.mxu1 %v3033_v61 }
 0x658   : > { %2735 = vmatprep.subr.bf16.mxu1 %v3035_v63 }
 0x65b   : > { %2736 = vmatpush3.bf16.msra.mxu1 %v3035_v63 }
 0x65c   : > { %2737 = vmatprep.subr.bf16.mxu1 %v3037_v1 }
 0x65e   : > { %v1766_v7 = vpop.f32.mrf.mxu0 }
 0x65f   : > { %2738 = vmatpush3.bf16.msra.mxu1 %v3037_v1 }
 0x660   : > { %2739 = vmatprep.subr.bf16.mxu1 %v3039_v3  ;;  %v2725_v8 = vpop.f32.mrf.mxu0 }
 0x662   : > { %v1769_v9 = vpop.f32.mrf.mxu0 }
 0x663   : > { %2740 = vmatpush3.bf16.msra.mxu1 %v3039_v3  ;;  %v1773_v10 = vpack.c.bf16 %v1769_v9, %v1766_v7  ;;  %v2489_v3 = vld [vmem:[%s4039_s13] ss:$0 sm:$0xff] }
 0x664   : > { %2741 = vmatprep.subr.bf16.mxu1 %v3041_v5  ;;  %v2726_v14 = vpop.f32.mrf.mxu0  ;;  %v2488_v7 = vld [vmem:[%s4038_s12] ss:$0 sm:$0xff] }
 0x667   : > { %2742 = vmatpush3.bf16.msra.mxu1 %v3041_v5 }
 0x668   : > { %2767 = vmatprep.subr.bf16.mxu1 %v3500_v26 }
 0x70a   : > { %v2564_v15 = vpop.f32.mrf.mxu1 }
 0x70c   : > { %v2565_v16 = vpop.f32.mrf.mxu1 }
 0x70d   : > { %v2566_v20 = vadd.f32 %v2565_v16, %v2564_v15 }
 0x70e   : > { %v2567_v11 = vpop.f32.mrf.mxu1 }
 0x70f   : > { %v1654_v24 = vadd.f32 %v2566_v20, %v3925_v12 }
 0x710   : > { %v2568_v21 = vpop.f32.mrf.mxu1 }
 0x711   : > { %v2569_v22 = vadd.f32 %v2568_v21, %v2567_v11 }
 0x712   : > { %v2570_v23 = vpop.f32.mrf.mxu1 }
 0x713   : > { %v1655_v17 = vadd.f32 %v2569_v22, %v3927_v13 }
 0x714   : > { %v2571_v25 = vpop.f32.mrf.mxu1 }
 0x715   : > { %v1658_v27 = vpack.c.bf16 %v1655_v17, %v1654_v24  ;;  %v2572_v29 = vadd.f32 %v2571_v25, %v2570_v23  ;;  %v2148_v24 = vld [vmem:[%s581_s3] sm:$0xff] }
 0x716   : > { %v2573_v28 = vpop.f32.mrf.mxu1 }
 0x717   : > { %2743 = vmatprep.mubr.bf16.mxu1 %v1658_v27  ;;  %2763 = vmatprep.mubr.bf16.mxu0 %v1658_v27  ;;  %v1656_v32 = vadd.f32 %v2572_v29, %v3935_v19 }
 0x718   : > { %v2574_v30 = vpop.f32.mrf.mxu1 }
 0x719   : > { %v2575_v31 = vadd.f32 %v2574_v30, %v2573_v28  ;;  %v2149_v28 = vld [vmem:[%s581_s3 + $0x8] sm:$0xff] }
 0x71b   : > { %v1657_v33 = vadd.f32 %v2575_v31, %v3933_v18 }
 0x71d   : > { %v1659_v34 = vpack.c.bf16 %v1657_v33, %v1656_v32 }
 0x71f   : > { %2744 = vmatmul.mubr.bf16.vlgmr.msra.gmra.mxu1 %v1659_v34  ;;  %2764 = vmatmul.mubr.bf16.vlgmr.msra.gmra.mxu0 %v1659_v34 }
 0x720   : > { %2771 = vmatprep.mubr.msk.bf16.mxu1 %vm3501_vm1, %v3500_v26  ;;  %2779 = vmatprep.mubr.msk.bf16.mxu0 %vm3501_vm1, %v3500_v26 }
 0x7df   : > { %v2745_v12 = vpop.f32.mrf.mxu1  ;;  %v2765_v13 = vpop.f32.mrf.mxu0 }
 0x7e1   : > { %v1872_v35 = vpop.f32.mrf.mxu1  ;;  %v1985_v36 = vpop.f32.mrf.mxu0 }
 0x7e3   : > { %v2746_v37 = vpop.f32.mrf.mxu1  ;;  %v2766_v38 = vpop.f32.mrf.mxu0 }
 0x7e4   : > { %v2001_v39 = vpack.c.bf16 %v2746_v37, %v2745_v12  ;;  %v2069_v40 = vpack.c.bf16 %v2766_v38, %v2765_v13 }
 0x7e5   : > { %v1988_v19 = vpop.f32.mrf.mxu0  ;;  %v1875_v41 = vpop.f32.mrf.mxu1 }
 0x7e6   : > { %2768 = vmatpush3.bf16.xpose.msra.mxu1 %v2001_v39  ;;  %2776 = vmatpush3.bf16.msra.mxu0 %v2069_v40  ;;  %v2068_v18 = vpack.c.bf16 %v1988_v19, %v1985_v36  ;;  %v2000_v42 = vpack.c.bf16 %v1875_v41, %v1872_v35 }
 0x7e7   : > { %2777 = vmatprep.subr.bf16.mxu0 %v3500_v26  ;;  %2769 = vmatprep.subr.bf16.mxu1 %v3500_v26 }
 0x7ea   : > { %2778 = vmatpush3.bf16.msra.mxu0 %v2068_v18 }
 0x7ee   : > { %2770 = vmatpush3.bf16.xpose.msra.mxu1 %v2000_v42 }
 0x7f5   : > { %2772 = vmatmul.mubr.bf16.vlgmr.msra.gmra.mxu1 %v1773_v10 }
 0x8b5   : > { %v2036_v43 = vpop.f32.mrf.mxu1 }
 0x8b6   : > { %v2043_v44 = vmul.f32 0.088388346, %v2036_v43 }
 0x8b7   : > { %v2773_v45 = vpop.f32.mrf.mxu1 }
 0x8b8   : > { %v2045_v46 = vsel %vm1093_vm0, %v2043_v44, -inf }
 0x8b9   : > { %2046 = vmax.xlane.f32.xlu0 %v2045_v46  ;;  %v2039_v47 = vpop.f32.mrf.mxu1 }
 0x8ba   : > { %v2044_v48 = vmul.f32 0.088388346, %v2039_v47 }
 0x8bb   : > { %v2774_v49 = vpop.f32.mrf.mxu1 }
 0x8bc   : > { %v2048_v50 = vsel %vm1093_vm0, %v2044_v48, -inf }
 0x8bd   : > { %2049 = vmax.xlane.f32.xlu1 %v2048_v50 }
 0x942   : > { %v2047_v51 = vpop.xlane.xlu0 %2046 }
 0x943   : > { %v2051_v26 = vsub.f32 %v2043_v44, %v2047_v51 }
 0x945   : > { %v2053_v52 = vmul.f32 1.442695, %v2051_v26 }
 0x946   : > { %v2050_v53 = vpop.xlane.xlu1 %2049 }
 0x947   : > { %3061 = vpow2.f32 %v2053_v52  ;;  %v2052_v54 = vsub.f32 %v2044_v48, %v2050_v53 }
 0x949   : > { %v2055_v55 = vmul.f32 1.442695, %v2052_v54 }
 0x94b   : > { %3063 = vpow2.f32 %v2055_v55 }
 0x954   : > { %v3062_v56 = vpop.eup %3061 }
 0x955   : > { %v2057_v57 = vsel %vm1093_vm0, %v3062_v56, 0.0 }
 0x956   : > { %2058 = vadd.xlane.f32.xlu0 %v2057_v57 }
 0x958   : > { %v3064_v58 = vpop.eup %3063 }
 0x959   : > { %v2060_v59 = vsel %vm1093_vm0, %v3064_v58, 0.0 }
 0x95a   : > { %2061 = vadd.xlane.f32.xlu1 %v2060_v59 }
 0x9df   : > { %v2059_v60 = vpop.xlane.xlu0 %2058 }
 0x9e0   : > { %3065 = vrcp.f32 %v2059_v60 }
 0x9e3   : > { %v2062_v61 = vpop.xlane.xlu1 %2061 }
 0x9e4   : > { %3067 = vrcp.f32 %v2062_v61 }
 0x9ed   : > { %v3066_v62 = vpop.eup %3065 }
 0x9ee   : > { %v2065_v0 = vmul.f32 %v3066_v62, %v3062_v56 }
 0x9f1   : > { %v3068_v63 = vpop.eup %3067 }
 0x9f2   : > { %v2066_v1 = vmul.f32 %v3068_v63, %v3064_v58 }
 0x9f4   : > { %v2067_v2 = vpack.c.bf16 %v2066_v1, %v2065_v0 }
 0x9f6   : > { %2780 = vmatmul.mubr.msk.bf16.vlgmr.msra.gmra.mxu0 %vm1093_vm0, %v2067_v2 }
 0xab6   : > { %v2107_v4 = vpop.f32.mrf.mxu0 }
 0xab7   : > { %v2134_v5 = vmul.f32 %v2489_v3, %v2107_v4  ;;  %v2121_v9 = vmul.f32 %v2488_v7, %v2107_v4 }
 0xab8   : > { %v2781_v6 = vpop.f32.mrf.mxu0 }
 0xab9   : > { %2136 = vadd.xlane.f32.xlu0 %v2134_v5 }
 0xaba   : > { %v2110_v8 = vpop.f32.mrf.mxu0 }
 0xabb   : > { %v2135_v10 = vmul.f32 %v2489_v3, %v2110_v8  ;;  %v2122_v15 = vmul.f32 %v2488_v7, %v2110_v8 }
 0xabc   : > { %v2782_v14 = vpop.f32.mrf.mxu0 }
 0xabd   : > { %2123 = vadd.xlane.f32.xlu0 %v2121_v9  ;;  %2138 = vadd.xlane.f32.xlu1 %v2135_v10 }
 0xac1   : > { %2125 = vadd.xlane.f32.xlu1 %v2122_v15 }
 0xb42   : > { %v2137_v16 = vpop.xlane.xlu0 %2136 }
 0xb43   : > { %v2490_v11 = vclamps-f32 %v2137_v16, 15.0 }
 0xb45   : > { %v2144_v20 = vmul.f32 1.442695, %v2490_v11 }
 0xb46   : > { %v2139_v21 = vpop.xlane.xlu1 %2138  ;;  %v2124_v27 = vpop.xlane.xlu0 %2123 }
 0xb47   : > { %3069 = vpow2.f32 %v2144_v20  ;;  %v2491_v22 = vclamps-f32 %v2139_v21, 15.0 }
 0xb49   : > { %v2146_v23 = vmul.f32 1.442695, %v2491_v22 }
 0xb4a   : > { %v2126_v32 = vpop.xlane.xlu1 %2125 }
 0xb4b   : > { %3071 = vpow2.f32 %v2146_v23 }
 0xb54   : > { %v3070_v17 = vpop.eup %3069 }
 0xb55   : > { %v2150_v25 = vmul.f32 %v3070_v17, %v2148_v24 }
 0xb57   : > { %v2152_v29 = vadd.f32 %v2150_v25, %v2124_v27 }
 0xb58   : > { %v3072_v30 = vpop.eup %3071 }
 0xb59   : > { %2154 = vst [vmem:[%s670_s2] sm:$0xff] %v2152_v29  ;;  %v2151_v31 = vmul.f32 %v3072_v30, %v2149_v28 }
 0xb5b   : > { %v2153_v33 = vadd.f32 %v2151_v31, %v2126_v32 }
 0xb5d   : > { %2155 = vst [vmem:[%s670_s2 + $0x8] sm:$0xff] %v2153_v33 }
 0xb5e   : > { %3402 = shalt.err (!%p3399_p0)
}
 0xb5f   : > { %s3403_s10 = scalar_lea.hbm %s3983_s27, 256  ;;  %s3407_s18 = scalar_lea.hbm %s4098_s25, 512 }
 0xb60   : > { %p3404_p5 = scmp.ne.s32.totalorder %s3983_s27, %s3403_s10  ;;  %p3408_p13 = scmp.lt.s32.totalorder %s3983_s27, %s4098_s25 }
 0xb61   : > { %p3409_p1 = scmp.lt.s32.totalorder %s3407_s18, %s3403_s10 }
 0xb62   : > { %p3405_p7 = pnand %p3404_p5, %p4099_p12 }
 0xb63   : > { %p3410_p6 = por %p3409_p1, %p3408_p13 }
 0xb64   : > { %p3406_p11 = pneg %p3405_p7 }
 0xb66   : > { %p3411_p10 = pnand %p3410_p6, %p3406_p11 }
 0xb68   : > { %3414 = shalt.err (!%p3411_p10)
}
 0xb69   : > { %s3503_s24 = smov 128   ;;  %s3504_s2 = smov 8  }
 0xb6a   : > { %2827 = dma.vmem_to_hbm [thread:$0]  (%p4099_p12), %s3978_s28, 256, %s3983_s27, %s2157_s4, %s3503_s24, %s3503_s24, %s3504_s2  }
 0xb6b PF: > { %s2185_s5 = sand.u32 1, %s3469_s29   ;;  %p4100_p3 = scmp.ne.s32.totalorder %s4081_s17, 0 }
 0xb6c   : > { %p4101_p9 = scmp.ge.s32.totalorder %s3481_s16, 2  ;;  %s2186_s6 = scalar_lea.sflag [#allocation4], %s2185_s5 }
 0xb6e   : > { %p2868_p8 = pnand %p4101_p9, %p4100_p3 }
 0xb70   : > { %p2869_p4 = pneg %p2868_p8 }
 0xb72   : > { %3464 = dma.done.wait (%p2869_p4), %s2186_s6, 256  }
 0xb73   : > { %3466 = vsyncadd (%p2869_p4), %s2186_s6, 4294967040  ;;  %s4102_s11 = sld [smem:[#allocation32_spill]]  ;;  %p35_p2 = scmp.ge.s32.totalorder %s3741_s26, 4  }
 0xb74   : > { %s4103_s29 = smov %s3473_s30  ;;  %s4104_s30 = smov %s3477_s15 }
 0xb75   : > { %s4106_s16 = smov %s3741_s26  ;;  %37 = sbr.rel (!%p35_p2) target bundleno = 24 (0x18), region = 174 }
 0xb79   : > { %s4105_s15 = smov %s4102_s11 }
 0xb7a   :  { %2191 = vsyncpa [#allocation3], 1 }
 0xb7b   :  { %2193 = vsyncpa [#allocation3 + $0x1], 1 }
 0xb7c   :  { %2194 = vsyncpa [#allocation6], 1 }
 0xb7d   :  { %2196 = vsyncpa [#allocation6 + $0x1], 1 }
 0xb7e   :  { %2197 = vsyncpa [#allocation9], 1 }
 0xb7f   :  { %2198 = vsyncpa [#allocation12], 1 }
 0xb80   :  { %2199 = vsyncpa [#allocation15], 1 }
 0xb81   :  { %2200 = vsyncpa [#allocation18], 1 }
 0xb82   :  { %2201 = vsyncpa [#allocation21], 1 }
 0xb83   :  { %2202 = vsyncpa [#allocation4], 1 }
 0xb84   :  { %2204 = vsyncpa [#allocation4 + $0x1], 1 }

</bundles_post_ra>
